<compile_context>
chip_gen: v7x
topology: tpu7x:2x2x1
jax: 0.10.0
libtpu: 0.0.40
codegen_flags: <defaults>
</compile_context>

<pallas_src>
import functools

import jax
import jax.numpy as jnp
from jax import lax
from jax.experimental import pallas as pl
from jax.experimental.pallas import tpu as pltpu


def _round_up(x, m):
    return (x + m - 1) // m * m


def lstm_classifier_kernel(
    embeds_ref,    # (Tt, Bb, E)   bf16  time-chunk of embedded inputs
    lens_ref,      # (Bb, 1)       int32 sequence lengths (0 for padded rows)
    w_ih_t_ref,    # (E, 4*Hp)     bf16  input weights, gate order i|f|o|g, transposed
    bias_ref,      # (1, 4*Hp)     f32   b_ih + b_hh, gate order i|f|o|g, padded
    w_hh_t_ref,    # (Hp, 4*Hp)    bf16  recurrent weights, transposed, padded
    h0_ref,        # (Bb, Hp)      f32
    c0_ref,        # (Bb, Hp)      f32
    w_out_t_ref,   # (Hp, Op)      bf16  hidden2out weight, transposed, zero-padded
    b_out_ref,     # (1, Op)       f32   bias; padded lanes hold -1e30 (softmax mask)
    out_ref,       # (Bb, Op)      f32   log-probabilities (padded lanes unused)
    h_scr,         # (Bb, Hp)      f32   scratch: hidden carry across time chunks
    c_scr,         # (Bb, Hp)      f32   scratch: cell carry across time chunks
):
    Tt, Bb, E = embeds_ref.shape
    Hp = h0_ref.shape[1]
    t_blk = pl.program_id(1)
    t_base = t_blk * Tt

    @pl.when(t_blk == 0)
    def _init():
        h_scr[...] = h0_ref[...]
        c_scr[...] = c0_ref[...]

    # Hoist every loop-invariant operand out of the serial recurrence, in
    # particular the lane broadcast of the lengths (once per chunk, not per
    # step, and off the h->h dependency chain).
    w_ih_t = w_ih_t_ref[...]
    w_hh_t = w_hh_t_ref[...]
    bias = bias_ref[...]
    lens_lane = jnp.broadcast_to(lens_ref[...], (Bb, Hp))     # (Bb, Hp) int32

    def step(t, carry):
        h, c = carry
        # Input projection for step t does NOT depend on the carry, so the
        # scheduler can overlap it (MXU) with the recurrent matmul latency.
        xp = jnp.dot(embeds_ref[t], w_ih_t, preferred_element_type=jnp.float32)
        gates = (xp + bias) + jnp.dot(
            h.astype(jnp.bfloat16), w_hh_t, preferred_element_type=jnp.float32)
        # Gate order i|f|o|g: one sigmoid over the contiguous i|f|o slab,
        # every slice is 128-lane aligned (Hp is a multiple of 128).
        sig = jax.nn.sigmoid(gates[:, : 3 * Hp])
        i_g = sig[:, 0 * Hp:1 * Hp]
        f_g = sig[:, 1 * Hp:2 * Hp]
        o_g = sig[:, 2 * Hp:3 * Hp]
        g_g = jnp.tanh(gates[:, 3 * Hp:])
        c_new = f_g * c + i_g * g_g
        h_new = o_g * jnp.tanh(c_new)
        # Packed-sequence freeze: precomputed lane-dense lengths, one compare
        # (off the carry chain) + one select per array on the VPU.
        active = (t_base + t) < lens_lane                     # (Bb, Hp) bool
        h = jnp.where(active, h_new, h)
        c = jnp.where(active, c_new, c)
        return h, c

    # Partial unroll: keeps LLO visibility for the projection/recurrence
    # overlap without blowing vreg pressure at large tiles.
    h, c = lax.fori_loop(0, Tt, step, (h_scr[...], c_scr[...]),
                         unroll=min(8, Tt))
    h_scr[...] = h
    c_scr[...] = c

    @pl.when(t_blk == pl.num_programs(1) - 1)
    def _finish():
        # dropout(p=0.2) -> identity (eval mode).
        logits = (jnp.dot(h.astype(jnp.bfloat16), w_out_t_ref[...],
                          preferred_element_type=jnp.float32)
                  + b_out_ref[...])        # padded lanes get -1e30 from b_out
        m_ = jnp.max(logits, axis=1, keepdims=True)
        shifted = logits - m_
        lse = jnp.log(jnp.sum(jnp.exp(shifted), axis=1, keepdims=True))
        out_ref[...] = shifted - lse


def _prep_gate_params(w_ih, w_hh, b_ih, b_hh, H, Hp):
    """Reorder PyTorch gates i|f|g|o -> i|f|o|g and zero-pad H to Hp."""
    def split(a):
        return a[0 * H:1 * H], a[1 * H:2 * H], a[2 * H:3 * H], a[3 * H:4 * H]

    i_ih, f_ih, g_ih, o_ih = split(w_ih)          # (H, E) each
    i_hh, f_hh, g_hh, o_hh = split(w_hh)          # (H, H) each
    i_b, f_b, g_b, o_b = split(b_ih + b_hh)       # (H,) each

    padr = lambda a: jnp.pad(a, ((0, Hp - H), (0, 0)))
    padv = lambda a: jnp.pad(a, (0, Hp - H))

    w_ih_r = jnp.concatenate([padr(a) for a in (i_ih, f_ih, o_ih, g_ih)], axis=0)
    w_hh_r = jnp.concatenate([padr(a) for a in (i_hh, f_hh, o_hh, g_hh)], axis=0)
    w_hh_r = jnp.pad(w_hh_r, ((0, 0), (0, Hp - H)))
    bias_r = jnp.concatenate([padv(a) for a in (i_b, f_b, o_b, g_b)])

    w_ih_t = jnp.transpose(w_ih_r).astype(jnp.bfloat16)      # (E, 4Hp)
    w_hh_t = jnp.transpose(w_hh_r).astype(jnp.bfloat16)      # (Hp, 4Hp)
    bias = bias_r.reshape(1, 4 * Hp).astype(jnp.float32)
    return w_ih_t, w_hh_t, bias


@functools.partial(jax.jit, static_argnames=("block_b", "block_t"))
def lstm_classifier_forward(embeds, lengths, w_ih, w_hh, b_ih, b_hh,
                            h0, c0, w_out, b_out, *, block_b=128, block_t=16):
    T, B, E = embeds.shape
    H = w_hh.shape[1]
    O = w_out.shape[0]

    # Cap tiles to the problem size (keeps tiny problems cheap), default to
    # MXU-filling 128-row batch tiles for realistic batches.
    block_b = min(block_b, _round_up(B, 8))
    # v7x megacore: prefer >= 2 batch tiles so the "parallel" axis actually
    # spans both TensorCores (no effect on 1-TC v5e/v6e).
    if _round_up(B, block_b) // block_b < 2 and block_b >= 32:
        block_b = _round_up(block_b // 2, 16)
    block_t = max(1, min(block_t, T))

    Hp = _round_up(H, 128)
    Op = _round_up(O, 128)
    Bp = _round_up(B, block_b)
    Tp = _round_up(T, block_t)

    w_ih_t, w_hh_t, bias = _prep_gate_params(
        w_ih.astype(jnp.float32), w_hh.astype(jnp.float32),
        b_ih.astype(jnp.float32), b_hh.astype(jnp.float32), H, Hp)

    # bf16 embeds: halves the only T-scaling HBM->VMEM stream.
    embeds_p = jnp.zeros((Tp, Bp, E), jnp.bfloat16).at[:T, :B].set(
        embeds.astype(jnp.bfloat16))

    # Lengths instead of a dense (Tp,Bp,1) mask array; padded rows get 0 so
    # they stay frozen at h0/c0 and are sliced away afterwards.
    lengths_p = jnp.zeros((Bp, 1), jnp.int32).at[:B, 0].set(
        lengths.astype(jnp.int32))

    h0_p = jnp.zeros((Bp, Hp), jnp.float32).at[:B, :H].set(h0.astype(jnp.float32))
    c0_p = jnp.zeros((Bp, Hp), jnp.float32).at[:B, :H].set(c0.astype(jnp.float32))

    w_out_t = jnp.zeros((Hp, Op), jnp.bfloat16).at[:H, :O].set(
        jnp.transpose(w_out).astype(jnp.bfloat16))
    b_out_p = jnp.full((1, Op), -1e30, jnp.float32).at[0, :O].set(
        b_out.astype(jnp.float32))

    grid = (Bp // block_b, Tp // block_t)   # (parallel batch tiles, serial time chunks)

    out_padded = pl.pallas_call(
        lstm_classifier_kernel,
        out_shape=jax.ShapeDtypeStruct((Bp, Op), jnp.float32),
        grid_spec=pltpu.PrefetchScalarGridSpec(
            num_scalar_prefetch=0,
            grid=grid,
            in_specs=[
                pl.BlockSpec((block_t, block_b, E), lambda b, t: (t, b, 0)),   # embeds
                pl.BlockSpec((block_b, 1), lambda b, t: (b, 0)),               # lengths
                pl.BlockSpec((E, 4 * Hp), lambda b, t: (0, 0)),                # w_ih_t
                pl.BlockSpec((1, 4 * Hp), lambda b, t: (0, 0)),                # bias
                pl.BlockSpec((Hp, 4 * Hp), lambda b, t: (0, 0)),               # w_hh_t
                pl.BlockSpec((block_b, Hp), lambda b, t: (b, 0)),              # h0
                pl.BlockSpec((block_b, Hp), lambda b, t: (b, 0)),              # c0
                pl.BlockSpec((Hp, Op), lambda b, t: (0, 0)),                   # w_out_t
                pl.BlockSpec((1, Op), lambda b, t: (0, 0)),                    # b_out
            ],
            out_specs=pl.BlockSpec((block_b, Op), lambda b, t: (b, 0)),
            scratch_shapes=[
                pltpu.VMEM((block_b, Hp), jnp.float32),               # h carry
                pltpu.VMEM((block_b, Hp), jnp.float32),               # c carry
            ],
        ),
        compiler_params=pltpu.CompilerParams(
            dimension_semantics=("parallel", "arbitrary"),
            vmem_limit_bytes=64 * 1024 * 1024),
    )(embeds_p, lengths_p, w_ih_t, bias, w_hh_t, h0_p, c0_p, w_out_t, b_out_p)

    return out_padded[:B, :O]


def _reference_forward(embeds, lengths, w_ih, w_hh, b_ih, b_hh,
                       h0, c0, w_out, b_out):
    """Pure-JAX f32 reference matching the PyTorch module semantics."""
    T, B, E = embeds.shape
    H = w_hh.shape[1]
    h, c = h0, c0
    for t in range(T):
        gates = embeds[t] @ w_ih.T + h @ w_hh.T + b_ih + b_hh
        i = jax.nn.sigmoid(gates[:, 0 * H:1 * H])
        f = jax.nn.sigmoid(gates[:, 1 * H:2 * H])
        g = jnp.tanh(gates[:, 2 * H:3 * H])
        o = jax.nn.sigmoid(gates[:, 3 * H:4 * H])
        c_new = f * c + i * g
        h_new = o * jnp.tanh(c_new)
        active = (t < lengths)[:, None]
        h = jnp.where(active, h_new, h)
        c = jnp.where(active, c_new, c)
    logits = h @ w_out.T + b_out
    return jax.nn.log_softmax(logits, axis=1)


if __name__ == "__main__":
    # Small shapes consistent with the module's forward pass.
    T = 8            # sequence length
    B = 2            # batch_size
    VOCAB = 50       # vocab_size
    E = 16           # embedding_dim
    H = 32           # hidden_dim
    O = 5            # output_size

    key = jax.random.PRNGKey(0)
    keys = jax.random.split(key, 10)

    # Deterministic synthetic parameters (shapes from __init__).
    emb_weights = jax.random.normal(keys[0], (VOCAB, E), jnp.float32)   # Embedding.weight
    w_ih = jax.random.normal(keys[1], (4 * H, E), jnp.float32) * 0.1    # lstm.weight_ih_l0
    w_hh = jax.random.normal(keys[2], (4 * H, H), jnp.float32) * 0.1    # lstm.weight_hh_l0
    b_ih = jax.random.normal(keys[3], (4 * H,), jnp.float32) * 0.1      # lstm.bias_ih_l0
    b_hh = jax.random.normal(keys[4], (4 * H,), jnp.float32) * 0.1      # lstm.bias_hh_l0
    w_out = jax.random.normal(keys[5], (O, H), jnp.float32) * 0.1       # hidden2out.weight
    b_out = jax.random.normal(keys[6], (O,), jnp.float32) * 0.1         # hidden2out.bias

    # init_hidden(): deterministic stand-in for torch.randn(1, B, H).
    h0 = jax.random.normal(keys[7], (B, H), jnp.float32)
    c0 = jax.random.normal(keys[8], (B, H), jnp.float32)

    # Inputs: token ids (T, B), lengths sorted descending (pack_padded_sequence).
    batch_ids = jax.random.randint(keys[9], (T, B), 0, VOCAB)
    lengths = jnp.array([T, T - 3], dtype=jnp.int32)

    # Glue: embedding lookup in plain JAX.
    embeds = emb_weights[batch_ids]    # (T, B, E)

    out = lstm_classifier_forward(
        embeds, lengths, w_ih, w_hh, b_ih, b_hh, h0, c0, w_out, b_out
    )
    out = jax.block_until_ready(out)

    ref = _reference_forward(
        embeds, lengths, w_ih, w_hh, b_ih, b_hh, h0, c0, w_out, b_out
    )
    assert out.shape == (B, O)
    max_err = float(jnp.max(jnp.abs(out - ref)))
    assert max_err < 3e-2, f"mismatch vs reference: max abs err {max_err}"

    print("KERNEL_OK")
</pallas_src>

<mosaic_0001>
module attributes {stable_mosaic.version = 11 : i64} {
  func.func @lstm_classifier_kernel(%arg0: i32, %arg1: i32, %arg2: memref<8x8x16xbf16, #tpu.memory_space<vmem>>, %arg3: memref<8x1xi32, #tpu.memory_space<vmem>>, %arg4: memref<16x512xbf16, #tpu.memory_space<vmem>>, %arg5: memref<1x512xf32, #tpu.memory_space<vmem>>, %arg6: memref<128x512xbf16, #tpu.memory_space<vmem>>, %arg7: memref<8x128xf32, #tpu.memory_space<vmem>>, %arg8: memref<8x128xf32, #tpu.memory_space<vmem>>, %arg9: memref<128x128xbf16, #tpu.memory_space<vmem>>, %arg10: memref<1x128xf32, #tpu.memory_space<vmem>>, %arg11: memref<8x128xf32, #tpu.memory_space<vmem>>, %arg12: memref<8x128xf32, #tpu.memory_space<vmem>>, %arg13: memref<8x128xf32, #tpu.memory_space<vmem>>) attributes {dimension_semantics = [#tpu.dimension_semantics<parallel>, #tpu.dimension_semantics<arbitrary>], iteration_bounds = array<i64: 1, 1>, scalar_prefetch = 0 : i64, scratch_operands = 2 : i64, tpu.core_type = #tpu.core_type<tc>, window_params = [{transform_indices = @transform_0, window_bounds = array<i64: 8, 8, 16>}, {transform_indices = @transform_1, window_bounds = array<i64: 8, 1>}, {pipeline_mode = #tpu.pipeline_mode<synchronous>, transform_indices = @transform_2, window_bounds = array<i64: 16, 512>}, {pipeline_mode = #tpu.pipeline_mode<synchronous>, transform_indices = @transform_3, window_bounds = array<i64: 1, 512>}, {pipeline_mode = #tpu.pipeline_mode<synchronous>, transform_indices = @transform_4, window_bounds = array<i64: 128, 512>}, {transform_indices = @transform_5, window_bounds = array<i64: 8, 128>}, {transform_indices = @transform_6, window_bounds = array<i64: 8, 128>}, {pipeline_mode = #tpu.pipeline_mode<synchronous>, transform_indices = @transform_7, window_bounds = array<i64: 128, 128>}, {pipeline_mode = #tpu.pipeline_mode<synchronous>, transform_indices = @transform_8, window_bounds = array<i64: 1, 128>}, {transform_indices = @transform_9, window_bounds = array<i64: 8, 128>}]} {
    %c8_i32 = arith.constant 8 : i32
    %0 = arith.muli %arg1, %c8_i32 : i32
    %c0_i32 = arith.constant 0 : i32
    %1 = arith.cmpi eq, %arg1, %c0_i32 : i32
    %2 = arith.extui %1 : i1 to i32
    %c0_i32_0 = arith.constant 0 : i32
    %3 = arith.cmpi ne, %2, %c0_i32_0 : i32
    scf.if %3 {
      %c0_59 = arith.constant 0 : index
      %c0_60 = arith.constant 0 : index
      %257 = vector.load %arg7[%c0_59, %c0_60] : memref<8x128xf32, #tpu.memory_space<vmem>>, vector<8x128xf32>
      %c0_61 = arith.constant 0 : index
      %c0_62 = arith.constant 0 : index
      %258 = vector.load %arg12[%c0_61, %c0_62] : memref<8x128xf32, #tpu.memory_space<vmem>>, vector<8x128xf32>
      tpu.vector_store %arg12[%c0_61, %c0_62], %257 {strides = array<i32>} : memref<8x128xf32, #tpu.memory_space<vmem>>, vector<8x128xf32>,
      %c0_63 = arith.constant 0 : index
      %c0_64 = arith.constant 0 : index
      %259 = vector.load %arg8[%c0_63, %c0_64] : memref<8x128xf32, #tpu.memory_space<vmem>>, vector<8x128xf32>
      %c0_65 = arith.constant 0 : index
      %c0_66 = arith.constant 0 : index
      %260 = vector.load %arg13[%c0_65, %c0_66] : memref<8x128xf32, #tpu.memory_space<vmem>>, vector<8x128xf32>
      tpu.vector_store %arg13[%c0_65, %c0_66], %259 {strides = array<i32>} : memref<8x128xf32, #tpu.memory_space<vmem>>, vector<8x128xf32>,
    } else {
    }
    %c0 = arith.constant 0 : index
    %c0_1 = arith.constant 0 : index
    %4 = vector.load %arg4[%c0, %c0_1] : memref<16x512xbf16, #tpu.memory_space<vmem>>, vector<16x512xbf16>
    %c0_2 = arith.constant 0 : index
    %c0_3 = arith.constant 0 : index
    %5 = vector.load %arg6[%c0_2, %c0_3] : memref<128x512xbf16, #tpu.memory_space<vmem>>, vector<128x512xbf16>
    %c0_4 = arith.constant 0 : index
    %c0_5 = arith.constant 0 : index
    %6 = vector.load %arg5[%c0_4, %c0_5] : memref<1x512xf32, #tpu.memory_space<vmem>>, vector<1x512xf32>
    %c0_6 = arith.constant 0 : index
    %c0_7 = arith.constant 0 : index
    %7 = vector.load %arg3[%c0_6, %c0_7] : memref<8x1xi32, #tpu.memory_space<vmem>>, vector<8x1xi32>
    %8 = vector.shape_cast %7 : vector<8x1xi32> to vector<8x1xi32>
    %9 = vector.broadcast %8 : vector<8x1xi32> to vector<8x128xi32>
    %c0_8 = arith.constant 0 : index
    %c0_9 = arith.constant 0 : index
    %10 = vector.load %arg12[%c0_8, %c0_9] : memref<8x128xf32, #tpu.memory_space<vmem>>, vector<8x128xf32>
    %c0_10 = arith.constant 0 : index
    %c0_11 = arith.constant 0 : index
    %11 = vector.load %arg13[%c0_10, %c0_11] : memref<8x128xf32, #tpu.memory_space<vmem>>, vector<8x128xf32>
    %c0_i32_12 = arith.constant 0 : i32
    %12 = arith.index_cast %c0_i32_12 : i32 to index
    %c0_13 = arith.constant 0 : index
    %c0_14 = arith.constant 0 : index
    %13 = vector.load %arg2[%12, %c0_13, %c0_14] : memref<8x8x16xbf16, #tpu.memory_space<vmem>>, vector<1x8x16xbf16>
    %14 = vector.shape_cast %13 : vector<1x8x16xbf16> to vector<8x16xbf16>
    %cst = arith.constant dense<0.000000e+00> : vector<8x512xf32>
    %15 = tpu.matmul %14, %4, %cst {dimension_numbers = #tpu.dot_dimension_numbers<[1], [0], [0], [1], [0, 0, 1, 1], [], []>} : vector<8x16xbf16>, vector<16x512xbf16>, vector<8x512xf32> -> vector<8x512xf32>
    %16 = vector.broadcast %6 : vector<1x512xf32> to vector<8x512xf32>
    %17 = arith.addf %15, %16 : vector<8x512xf32>
    %18 = arith.truncf %10 : vector<8x128xf32> to vector<8x128xbf16>
    %cst_15 = arith.constant dense<0.000000e+00> : vector<8x512xf32>
    %19 = tpu.matmul %18, %5, %cst_15 {dimension_numbers = #tpu.dot_dimension_numbers<[1], [0], [0], [1], [0, 0, 1, 1], [], []>} : vector<8x128xbf16>, vector<128x512xbf16>, vector<8x512xf32> -> vector<8x512xf32>
    %20 = arith.addf %17, %19 : vector<8x512xf32>
    %21 = vector.extract_strided_slice %20 {offsets = [0, 0], sizes = [8, 384], strides = [1, 1]} : vector<8x512xf32> to vector<8x384xf32>
    %22 = arith.negf %21 : vector<8x384xf32>
    %23 = math.exp %22 : vector<8x384xf32>
    %cst_16 = arith.constant 1.000000e+00 : f32
    %24 = vector.broadcast %cst_16 : f32 to vector<8x384xf32>
    %25 = arith.addf %24, %23 : vector<8x384xf32>
    %26 = arith.divf %24, %25 : vector<8x384xf32>
    %27 = vector.extract_strided_slice %26 {offsets = [0, 0], sizes = [8, 128], strides = [1, 1]} : vector<8x384xf32> to vector<8x128xf32>
    %28 = vector.extract_strided_slice %26 {offsets = [0, 128], sizes = [8, 128], strides = [1, 1]} : vector<8x384xf32> to vector<8x128xf32>
    %29 = vector.extract_strided_slice %26 {offsets = [0, 256], sizes = [8, 128], strides = [1, 1]} : vector<8x384xf32> to vector<8x128xf32>
    %30 = vector.extract_strided_slice %20 {offsets = [0, 384], sizes = [8, 128], strides = [1, 1]} : vector<8x512xf32> to vector<8x128xf32>
    %31 = math.tanh %30 : vector<8x128xf32>
    %32 = arith.mulf %28, %11 : vector<8x128xf32>
    %33 = arith.mulf %27, %31 : vector<8x128xf32>
    %34 = arith.addf %32, %33 : vector<8x128xf32>
    %35 = math.tanh %34 : vector<8x128xf32>
    %36 = arith.mulf %29, %35 : vector<8x128xf32>
    %37 = arith.addi %0, %c0_i32_12 : i32
    %38 = vector.broadcast %37 : i32 to vector<8x128xi32>
    %39 = arith.cmpi slt, %38, %9 : vector<8x128xi32>
    %40 = arith.select %39, %36, %10 : vector<8x128xi1>, vector<8x128xf32>
    %41 = arith.select %39, %34, %11 : vector<8x128xi1>, vector<8x128xf32>
    %c1_i32 = arith.constant 1 : i32
    %42 = arith.index_cast %c1_i32 : i32 to index
    %c0_17 = arith.constant 0 : index
    %c0_18 = arith.constant 0 : index
    %43 = vector.load %arg2[%42, %c0_17, %c0_18] : memref<8x8x16xbf16, #tpu.memory_space<vmem>>, vector<1x8x16xbf16>
    %44 = vector.shape_cast %43 : vector<1x8x16xbf16> to vector<8x16xbf16>
    %cst_19 = arith.constant dense<0.000000e+00> : vector<8x512xf32>
    %45 = tpu.matmul %44, %4, %cst_19 {dimension_numbers = #tpu.dot_dimension_numbers<[1], [0], [0], [1], [0, 0, 1, 1], [], []>} : vector<8x16xbf16>, vector<16x512xbf16>, vector<8x512xf32> -> vector<8x512xf32>
    %46 = vector.broadcast %6 : vector<1x512xf32> to vector<8x512xf32>
    %47 = arith.addf %45, %46 : vector<8x512xf32>
    %48 = arith.truncf %40 : vector<8x128xf32> to vector<8x128xbf16>
    %cst_20 = arith.constant dense<0.000000e+00> : vector<8x512xf32>
    %49 = tpu.matmul %48, %5, %cst_20 {dimension_numbers = #tpu.dot_dimension_numbers<[1], [0], [0], [1], [0, 0, 1, 1], [], []>} : vector<8x128xbf16>, vector<128x512xbf16>, vector<8x512xf32> -> vector<8x512xf32>
    %50 = arith.addf %47, %49 : vector<8x512xf32>
    %51 = vector.extract_strided_slice %50 {offsets = [0, 0], sizes = [8, 384], strides = [1, 1]} : vector<8x512xf32> to vector<8x384xf32>
    %52 = arith.negf %51 : vector<8x384xf32>
    %53 = math.exp %52 : vector<8x384xf32>
    %cst_21 = arith.constant 1.000000e+00 : f32
    %54 = vector.broadcast %cst_21 : f32 to vector<8x384xf32>
    %55 = arith.addf %54, %53 : vector<8x384xf32>
    %56 = arith.divf %54, %55 : vector<8x384xf32>
    %57 = vector.extract_strided_slice %56 {offsets = [0, 0], sizes = [8, 128], strides = [1, 1]} : vector<8x384xf32> to vector<8x128xf32>
    %58 = vector.extract_strided_slice %56 {offsets = [0, 128], sizes = [8, 128], strides = [1, 1]} : vector<8x384xf32> to vector<8x128xf32>
    %59 = vector.extract_strided_slice %56 {offsets = [0, 256], sizes = [8, 128], strides = [1, 1]} : vector<8x384xf32> to vector<8x128xf32>
    %60 = vector.extract_strided_slice %50 {offsets = [0, 384], sizes = [8, 128], strides = [1, 1]} : vector<8x512xf32> to vector<8x128xf32>
    %61 = math.tanh %60 : vector<8x128xf32>
    %62 = arith.mulf %58, %41 : vector<8x128xf32>
    %63 = arith.mulf %57, %61 : vector<8x128xf32>
    %64 = arith.addf %62, %63 : vector<8x128xf32>
    %65 = math.tanh %64 : vector<8x128xf32>
    %66 = arith.mulf %59, %65 : vector<8x128xf32>
    %67 = arith.addi %0, %c1_i32 : i32
    %68 = vector.broadcast %67 : i32 to vector<8x128xi32>
    %69 = arith.cmpi slt, %68, %9 : vector<8x128xi32>
    %70 = arith.select %69, %66, %40 : vector<8x128xi1>, vector<8x128xf32>
    %71 = arith.select %69, %64, %41 : vector<8x128xi1>, vector<8x128xf32>
    %c2_i32 = arith.constant 2 : i32
    %72 = arith.index_cast %c2_i32 : i32 to index
    %c0_22 = arith.constant 0 : index
    %c0_23 = arith.constant 0 : index
    %73 = vector.load %arg2[%72, %c0_22, %c0_23] : memref<8x8x16xbf16, #tpu.memory_space<vmem>>, vector<1x8x16xbf16>
    %74 = vector.shape_cast %73 : vector<1x8x16xbf16> to vector<8x16xbf16>
    %cst_24 = arith.constant dense<0.000000e+00> : vector<8x512xf32>
    %75 = tpu.matmul %74, %4, %cst_24 {dimension_numbers = #tpu.dot_dimension_numbers<[1], [0], [0], [1], [0, 0, 1, 1], [], []>} : vector<8x16xbf16>, vector<16x512xbf16>, vector<8x512xf32> -> vector<8x512xf32>
    %76 = vector.broadcast %6 : vector<1x512xf32> to vector<8x512xf32>
    %77 = arith.addf %75, %76 : vector<8x512xf32>
    %78 = arith.truncf %70 : vector<8x128xf32> to vector<8x128xbf16>
    %cst_25 = arith.constant dense<0.000000e+00> : vector<8x512xf32>
    %79 = tpu.matmul %78, %5, %cst_25 {dimension_numbers = #tpu.dot_dimension_numbers<[1], [0], [0], [1], [0, 0, 1, 1], [], []>} : vector<8x128xbf16>, vector<128x512xbf16>, vector<8x512xf32> -> vector<8x512xf32>
    %80 = arith.addf %77, %79 : vector<8x512xf32>
    %81 = vector.extract_strided_slice %80 {offsets = [0, 0], sizes = [8, 384], strides = [1, 1]} : vector<8x512xf32> to vector<8x384xf32>
    %82 = arith.negf %81 : vector<8x384xf32>
    %83 = math.exp %82 : vector<8x384xf32>
    %cst_26 = arith.constant 1.000000e+00 : f32
    %84 = vector.broadcast %cst_26 : f32 to vector<8x384xf32>
    %85 = arith.addf %84, %83 : vector<8x384xf32>
    %86 = arith.divf %84, %85 : vector<8x384xf32>
    %87 = vector.extract_strided_slice %86 {offsets = [0, 0], sizes = [8, 128], strides = [1, 1]} : vector<8x384xf32> to vector<8x128xf32>
    %88 = vector.extract_strided_slice %86 {offsets = [0, 128], sizes = [8, 128], strides = [1, 1]} : vector<8x384xf32> to vector<8x128xf32>
    %89 = vector.extract_strided_slice %86 {offsets = [0, 256], sizes = [8, 128], strides = [1, 1]} : vector<8x384xf32> to vector<8x128xf32>
    %90 = vector.extract_strided_slice %80 {offsets = [0, 384], sizes = [8, 128], strides = [1, 1]} : vector<8x512xf32> to vector<8x128xf32>
    %91 = math.tanh %90 : vector<8x128xf32>
    %92 = arith.mulf %88, %71 : vector<8x128xf32>
    %93 = arith.mulf %87, %91 : vector<8x128xf32>
    %94 = arith.addf %92, %93 : vector<8x128xf32>
    %95 = math.tanh %94 : vector<8x128xf32>
    %96 = arith.mulf %89, %95 : vector<8x128xf32>
    %97 = arith.addi %0, %c2_i32 : i32
    %98 = vector.broadcast %97 : i32 to vector<8x128xi32>
    %99 = arith.cmpi slt, %98, %9 : vector<8x128xi32>
    %100 = arith.select %99, %96, %70 : vector<8x128xi1>, vector<8x128xf32>
    %101 = arith.select %99, %94, %71 : vector<8x128xi1>, vector<8x128xf32>
    %c3_i32 = arith.constant 3 : i32
    %102 = arith.index_cast %c3_i32 : i32 to index
    %c0_27 = arith.constant 0 : index
    %c0_28 = arith.constant 0 : index
    %103 = vector.load %arg2[%102, %c0_27, %c0_28] : memref<8x8x16xbf16, #tpu.memory_space<vmem>>, vector<1x8x16xbf16>
    %104 = vector.shape_cast %103 : vector<1x8x16xbf16> to vector<8x16xbf16>
    %cst_29 = arith.constant dense<0.000000e+00> : vector<8x512xf32>
    %105 = tpu.matmul %104, %4, %cst_29 {dimension_numbers = #tpu.dot_dimension_numbers<[1], [0], [0], [1], [0, 0, 1, 1], [], []>} : vector<8x16xbf16>, vector<16x512xbf16>, vector<8x512xf32> -> vector<8x512xf32>
    %106 = vector.broadcast %6 : vector<1x512xf32> to vector<8x512xf32>
    %107 = arith.addf %105, %106 : vector<8x512xf32>
    %108 = arith.truncf %100 : vector<8x128xf32> to vector<8x128xbf16>
    %cst_30 = arith.constant dense<0.000000e+00> : vector<8x512xf32>
    %109 = tpu.matmul %108, %5, %cst_30 {dimension_numbers = #tpu.dot_dimension_numbers<[1], [0], [0], [1], [0, 0, 1, 1], [], []>} : vector<8x128xbf16>, vector<128x512xbf16>, vector<8x512xf32> -> vector<8x512xf32>
    %110 = arith.addf %107, %109 : vector<8x512xf32>
    %111 = vector.extract_strided_slice %110 {offsets = [0, 0], sizes = [8, 384], strides = [1, 1]} : vector<8x512xf32> to vector<8x384xf32>
    %112 = arith.negf %111 : vector<8x384xf32>
    %113 = math.exp %112 : vector<8x384xf32>
    %cst_31 = arith.constant 1.000000e+00 : f32
    %114 = vector.broadcast %cst_31 : f32 to vector<8x384xf32>
    %115 = arith.addf %114, %113 : vector<8x384xf32>
    %116 = arith.divf %114, %115 : vector<8x384xf32>
    %117 = vector.extract_strided_slice %116 {offsets = [0, 0], sizes = [8, 128], strides = [1, 1]} : vector<8x384xf32> to vector<8x128xf32>
    %118 = vector.extract_strided_slice %116 {offsets = [0, 128], sizes = [8, 128], strides = [1, 1]} : vector<8x384xf32> to vector<8x128xf32>
    %119 = vector.extract_strided_slice %116 {offsets = [0, 256], sizes = [8, 128], strides = [1, 1]} : vector<8x384xf32> to vector<8x128xf32>
    %120 = vector.extract_strided_slice %110 {offsets = [0, 384], sizes = [8, 128], strides = [1, 1]} : vector<8x512xf32> to vector<8x128xf32>
    %121 = math.tanh %120 : vector<8x128xf32>
    %122 = arith.mulf %118, %101 : vector<8x128xf32>
    %123 = arith.mulf %117, %121 : vector<8x128xf32>
    %124 = arith.addf %122, %123 : vector<8x128xf32>
    %125 = math.tanh %124 : vector<8x128xf32>
    %126 = arith.mulf %119, %125 : vector<8x128xf32>
    %127 = arith.addi %0, %c3_i32 : i32
    %128 = vector.broadcast %127 : i32 to vector<8x128xi32>
    %129 = arith.cmpi slt, %128, %9 : vector<8x128xi32>
    %130 = arith.select %129, %126, %100 : vector<8x128xi1>, vector<8x128xf32>
    %131 = arith.select %129, %124, %101 : vector<8x128xi1>, vector<8x128xf32>
    %c4_i32 = arith.constant 4 : i32
    %132 = arith.index_cast %c4_i32 : i32 to index
    %c0_32 = arith.constant 0 : index
    %c0_33 = arith.constant 0 : index
    %133 = vector.load %arg2[%132, %c0_32, %c0_33] : memref<8x8x16xbf16, #tpu.memory_space<vmem>>, vector<1x8x16xbf16>
    %134 = vector.shape_cast %133 : vector<1x8x16xbf16> to vector<8x16xbf16>
    %cst_34 = arith.constant dense<0.000000e+00> : vector<8x512xf32>
    %135 = tpu.matmul %134, %4, %cst_34 {dimension_numbers = #tpu.dot_dimension_numbers<[1], [0], [0], [1], [0, 0, 1, 1], [], []>} : vector<8x16xbf16>, vector<16x512xbf16>, vector<8x512xf32> -> vector<8x512xf32>
    %136 = vector.broadcast %6 : vector<1x512xf32> to vector<8x512xf32>
    %137 = arith.addf %135, %136 : vector<8x512xf32>
    %138 = arith.truncf %130 : vector<8x128xf32> to vector<8x128xbf16>
    %cst_35 = arith.constant dense<0.000000e+00> : vector<8x512xf32>
    %139 = tpu.matmul %138, %5, %cst_35 {dimension_numbers = #tpu.dot_dimension_numbers<[1], [0], [0], [1], [0, 0, 1, 1], [], []>} : vector<8x128xbf16>, vector<128x512xbf16>, vector<8x512xf32> -> vector<8x512xf32>
    %140 = arith.addf %137, %139 : vector<8x512xf32>
    %141 = vector.extract_strided_slice %140 {offsets = [0, 0], sizes = [8, 384], strides = [1, 1]} : vector<8x512xf32> to vector<8x384xf32>
    %142 = arith.negf %141 : vector<8x384xf32>
    %143 = math.exp %142 : vector<8x384xf32>
    %cst_36 = arith.constant 1.000000e+00 : f32
    %144 = vector.broadcast %cst_36 : f32 to vector<8x384xf32>
    %145 = arith.addf %144, %143 : vector<8x384xf32>
    %146 = arith.divf %144, %145 : vector<8x384xf32>
    %147 = vector.extract_strided_slice %146 {offsets = [0, 0], sizes = [8, 128], strides = [1, 1]} : vector<8x384xf32> to vector<8x128xf32>
    %148 = vector.extract_strided_slice %146 {offsets = [0, 128], sizes = [8, 128], strides = [1, 1]} : vector<8x384xf32> to vector<8x128xf32>
    %149 = vector.extract_strided_slice %146 {offsets = [0, 256], sizes = [8, 128], strides = [1, 1]} : vector<8x384xf32> to vector<8x128xf32>
    %150 = vector.extract_strided_slice %140 {offsets = [0, 384], sizes = [8, 128], strides = [1, 1]} : vector<8x512xf32> to vector<8x128xf32>
    %151 = math.tanh %150 : vector<8x128xf32>
    %152 = arith.mulf %148, %131 : vector<8x128xf32>
    %153 = arith.mulf %147, %151 : vector<8x128xf32>
    %154 = arith.addf %152, %153 : vector<8x128xf32>
    %155 = math.tanh %154 : vector<8x128xf32>
    %156 = arith.mulf %149, %155 : vector<8x128xf32>
    %157 = arith.addi %0, %c4_i32 : i32
    %158 = vector.broadcast %157 : i32 to vector<8x128xi32>
    %159 = arith.cmpi slt, %158, %9 : vector<8x128xi32>
    %160 = arith.select %159, %156, %130 : vector<8x128xi1>, vector<8x128xf32>
    %161 = arith.select %159, %154, %131 : vector<8x128xi1>, vector<8x128xf32>
    %c5_i32 = arith.constant 5 : i32
    %162 = arith.index_cast %c5_i32 : i32 to index
    %c0_37 = arith.constant 0 : index
    %c0_38 = arith.constant 0 : index
    %163 = vector.load %arg2[%162, %c0_37, %c0_38] : memref<8x8x16xbf16, #tpu.memory_space<vmem>>, vector<1x8x16xbf16>
    %164 = vector.shape_cast %163 : vector<1x8x16xbf16> to vector<8x16xbf16>
    %cst_39 = arith.constant dense<0.000000e+00> : vector<8x512xf32>
    %165 = tpu.matmul %164, %4, %cst_39 {dimension_numbers = #tpu.dot_dimension_numbers<[1], [0], [0], [1], [0, 0, 1, 1], [], []>} : vector<8x16xbf16>, vector<16x512xbf16>, vector<8x512xf32> -> vector<8x512xf32>
    %166 = vector.broadcast %6 : vector<1x512xf32> to vector<8x512xf32>
    %167 = arith.addf %165, %166 : vector<8x512xf32>
    %168 = arith.truncf %160 : vector<8x128xf32> to vector<8x128xbf16>
    %cst_40 = arith.constant dense<0.000000e+00> : vector<8x512xf32>
    %169 = tpu.matmul %168, %5, %cst_40 {dimension_numbers = #tpu.dot_dimension_numbers<[1], [0], [0], [1], [0, 0, 1, 1], [], []>} : vector<8x128xbf16>, vector<128x512xbf16>, vector<8x512xf32> -> vector<8x512xf32>
    %170 = arith.addf %167, %169 : vector<8x512xf32>
    %171 = vector.extract_strided_slice %170 {offsets = [0, 0], sizes = [8, 384], strides = [1, 1]} : vector<8x512xf32> to vector<8x384xf32>
    %172 = arith.negf %171 : vector<8x384xf32>
    %173 = math.exp %172 : vector<8x384xf32>
    %cst_41 = arith.constant 1.000000e+00 : f32
    %174 = vector.broadcast %cst_41 : f32 to vector<8x384xf32>
    %175 = arith.addf %174, %173 : vector<8x384xf32>
    %176 = arith.divf %174, %175 : vector<8x384xf32>
    %177 = vector.extract_strided_slice %176 {offsets = [0, 0], sizes = [8, 128], strides = [1, 1]} : vector<8x384xf32> to vector<8x128xf32>
    %178 = vector.extract_strided_slice %176 {offsets = [0, 128], sizes = [8, 128], strides = [1, 1]} : vector<8x384xf32> to vector<8x128xf32>
    %179 = vector.extract_strided_slice %176 {offsets = [0, 256], sizes = [8, 128], strides = [1, 1]} : vector<8x384xf32> to vector<8x128xf32>
    %180 = vector.extract_strided_slice %170 {offsets = [0, 384], sizes = [8, 128], strides = [1, 1]} : vector<8x512xf32> to vector<8x128xf32>
    %181 = math.tanh %180 : vector<8x128xf32>
    %182 = arith.mulf %178, %161 : vector<8x128xf32>
    %183 = arith.mulf %177, %181 : vector<8x128xf32>
    %184 = arith.addf %182, %183 : vector<8x128xf32>
    %185 = math.tanh %184 : vector<8x128xf32>
    %186 = arith.mulf %179, %185 : vector<8x128xf32>
    %187 = arith.addi %0, %c5_i32 : i32
    %188 = vector.broadcast %187 : i32 to vector<8x128xi32>
    %189 = arith.cmpi slt, %188, %9 : vector<8x128xi32>
    %190 = arith.select %189, %186, %160 : vector<8x128xi1>, vector<8x128xf32>
    %191 = arith.select %189, %184, %161 : vector<8x128xi1>, vector<8x128xf32>
    %c6_i32 = arith.constant 6 : i32
    %192 = arith.index_cast %c6_i32 : i32 to index
    %c0_42 = arith.constant 0 : index
    %c0_43 = arith.constant 0 : index
    %193 = vector.load %arg2[%192, %c0_42, %c0_43] : memref<8x8x16xbf16, #tpu.memory_space<vmem>>, vector<1x8x16xbf16>
    %194 = vector.shape_cast %193 : vector<1x8x16xbf16> to vector<8x16xbf16>
    %cst_44 = arith.constant dense<0.000000e+00> : vector<8x512xf32>
    %195 = tpu.matmul %194, %4, %cst_44 {dimension_numbers = #tpu.dot_dimension_numbers<[1], [0], [0], [1], [0, 0, 1, 1], [], []>} : vector<8x16xbf16>, vector<16x512xbf16>, vector<8x512xf32> -> vector<8x512xf32>
    %196 = vector.broadcast %6 : vector<1x512xf32> to vector<8x512xf32>
    %197 = arith.addf %195, %196 : vector<8x512xf32>
    %198 = arith.truncf %190 : vector<8x128xf32> to vector<8x128xbf16>
    %cst_45 = arith.constant dense<0.000000e+00> : vector<8x512xf32>
    %199 = tpu.matmul %198, %5, %cst_45 {dimension_numbers = #tpu.dot_dimension_numbers<[1], [0], [0], [1], [0, 0, 1, 1], [], []>} : vector<8x128xbf16>, vector<128x512xbf16>, vector<8x512xf32> -> vector<8x512xf32>
    %200 = arith.addf %197, %199 : vector<8x512xf32>
    %201 = vector.extract_strided_slice %200 {offsets = [0, 0], sizes = [8, 384], strides = [1, 1]} : vector<8x512xf32> to vector<8x384xf32>
    %202 = arith.negf %201 : vector<8x384xf32>
    %203 = math.exp %202 : vector<8x384xf32>
    %cst_46 = arith.constant 1.000000e+00 : f32
    %204 = vector.broadcast %cst_46 : f32 to vector<8x384xf32>
    %205 = arith.addf %204, %203 : vector<8x384xf32>
    %206 = arith.divf %204, %205 : vector<8x384xf32>
    %207 = vector.extract_strided_slice %206 {offsets = [0, 0], sizes = [8, 128], strides = [1, 1]} : vector<8x384xf32> to vector<8x128xf32>
    %208 = vector.extract_strided_slice %206 {offsets = [0, 128], sizes = [8, 128], strides = [1, 1]} : vector<8x384xf32> to vector<8x128xf32>
    %209 = vector.extract_strided_slice %206 {offsets = [0, 256], sizes = [8, 128], strides = [1, 1]} : vector<8x384xf32> to vector<8x128xf32>
    %210 = vector.extract_strided_slice %200 {offsets = [0, 384], sizes = [8, 128], strides = [1, 1]} : vector<8x512xf32> to vector<8x128xf32>
    %211 = math.tanh %210 : vector<8x128xf32>
    %212 = arith.mulf %208, %191 : vector<8x128xf32>
    %213 = arith.mulf %207, %211 : vector<8x128xf32>
    %214 = arith.addf %212, %213 : vector<8x128xf32>
    %215 = math.tanh %214 : vector<8x128xf32>
    %216 = arith.mulf %209, %215 : vector<8x128xf32>
    %217 = arith.addi %0, %c6_i32 : i32
    %218 = vector.broadcast %217 : i32 to vector<8x128xi32>
    %219 = arith.cmpi slt, %218, %9 : vector<8x128xi32>
    %220 = arith.select %219, %216, %190 : vector<8x128xi1>, vector<8x128xf32>
    %221 = arith.select %219, %214, %191 : vector<8x128xi1>, vector<8x128xf32>
    %c7_i32 = arith.constant 7 : i32
    %222 = arith.index_cast %c7_i32 : i32 to index
    %c0_47 = arith.constant 0 : index
    %c0_48 = arith.constant 0 : index
    %223 = vector.load %arg2[%222, %c0_47, %c0_48] : memref<8x8x16xbf16, #tpu.memory_space<vmem>>, vector<1x8x16xbf16>
    %224 = vector.shape_cast %223 : vector<1x8x16xbf16> to vector<8x16xbf16>
    %cst_49 = arith.constant dense<0.000000e+00> : vector<8x512xf32>
    %225 = tpu.matmul %224, %4, %cst_49 {dimension_numbers = #tpu.dot_dimension_numbers<[1], [0], [0], [1], [0, 0, 1, 1], [], []>} : vector<8x16xbf16>, vector<16x512xbf16>, vector<8x512xf32> -> vector<8x512xf32>
    %226 = vector.broadcast %6 : vector<1x512xf32> to vector<8x512xf32>
    %227 = arith.addf %225, %226 : vector<8x512xf32>
    %228 = arith.truncf %220 : vector<8x128xf32> to vector<8x128xbf16>
    %cst_50 = arith.constant dense<0.000000e+00> : vector<8x512xf32>
    %229 = tpu.matmul %228, %5, %cst_50 {dimension_numbers = #tpu.dot_dimension_numbers<[1], [0], [0], [1], [0, 0, 1, 1], [], []>} : vector<8x128xbf16>, vector<128x512xbf16>, vector<8x512xf32> -> vector<8x512xf32>
    %230 = arith.addf %227, %229 : vector<8x512xf32>
    %231 = vector.extract_strided_slice %230 {offsets = [0, 0], sizes = [8, 384], strides = [1, 1]} : vector<8x512xf32> to vector<8x384xf32>
    %232 = arith.negf %231 : vector<8x384xf32>
    %233 = math.exp %232 : vector<8x384xf32>
    %cst_51 = arith.constant 1.000000e+00 : f32
    %234 = vector.broadcast %cst_51 : f32 to vector<8x384xf32>
    %235 = arith.addf %234, %233 : vector<8x384xf32>
    %236 = arith.divf %234, %235 : vector<8x384xf32>
    %237 = vector.extract_strided_slice %236 {offsets = [0, 0], sizes = [8, 128], strides = [1, 1]} : vector<8x384xf32> to vector<8x128xf32>
    %238 = vector.extract_strided_slice %236 {offsets = [0, 128], sizes = [8, 128], strides = [1, 1]} : vector<8x384xf32> to vector<8x128xf32>
    %239 = vector.extract_strided_slice %236 {offsets = [0, 256], sizes = [8, 128], strides = [1, 1]} : vector<8x384xf32> to vector<8x128xf32>
    %240 = vector.extract_strided_slice %230 {offsets = [0, 384], sizes = [8, 128], strides = [1, 1]} : vector<8x512xf32> to vector<8x128xf32>
    %241 = math.tanh %240 : vector<8x128xf32>
    %242 = arith.mulf %238, %221 : vector<8x128xf32>
    %243 = arith.mulf %237, %241 : vector<8x128xf32>
    %244 = arith.addf %242, %243 : vector<8x128xf32>
    %245 = math.tanh %244 : vector<8x128xf32>
    %246 = arith.mulf %239, %245 : vector<8x128xf32>
    %247 = arith.addi %0, %c7_i32 : i32
    %248 = vector.broadcast %247 : i32 to vector<8x128xi32>
    %249 = arith.cmpi slt, %248, %9 : vector<8x128xi32>
    %250 = arith.select %249, %246, %220 : vector<8x128xi1>, vector<8x128xf32>
    %251 = arith.select %249, %244, %221 : vector<8x128xi1>, vector<8x128xf32>
    %c8_i32_52 = arith.constant 8 : i32
    %c0_53 = arith.constant 0 : index
    %c0_54 = arith.constant 0 : index
    %252 = vector.load %arg12[%c0_53, %c0_54] : memref<8x128xf32, #tpu.memory_space<vmem>>, vector<8x128xf32>
    tpu.vector_store %arg12[%c0_53, %c0_54], %250 {strides = array<i32>} : memref<8x128xf32, #tpu.memory_space<vmem>>, vector<8x128xf32>,
    %c0_55 = arith.constant 0 : index
    %c0_56 = arith.constant 0 : index
    %253 = vector.load %arg13[%c0_55, %c0_56] : memref<8x128xf32, #tpu.memory_space<vmem>>, vector<8x128xf32>
    tpu.vector_store %arg13[%c0_55, %c0_56], %251 {strides = array<i32>} : memref<8x128xf32, #tpu.memory_space<vmem>>, vector<8x128xf32>,
    %c0_i32_57 = arith.constant 0 : i32
    %254 = arith.cmpi eq, %arg1, %c0_i32_57 : i32
    %255 = arith.extui %254 : i1 to i32
    %c0_i32_58 = arith.constant 0 : i32
    %256 = arith.cmpi ne, %255, %c0_i32_58 : i32
    scf.if %256 {
      %257 = arith.truncf %250 : vector<8x128xf32> to vector<8x128xbf16>
      %c0_59 = arith.constant 0 : index
      %c0_60 = arith.constant 0 : index
      %258 = vector.load %arg9[%c0_59, %c0_60] : memref<128x128xbf16, #tpu.memory_space<vmem>>, vector<128x128xbf16>
      %cst_61 = arith.constant dense<0.000000e+00> : vector<8x128xf32>
      %259 = tpu.matmul %257, %258, %cst_61 {dimension_numbers = #tpu.dot_dimension_numbers<[1], [0], [0], [1], [0, 0, 1, 1], [], []>} : vector<8x128xbf16>, vector<128x128xbf16>, vector<8x128xf32> -> vector<8x128xf32>
      %c0_62 = arith.constant 0 : index
      %c0_63 = arith.constant 0 : index
      %260 = vector.load %arg10[%c0_62, %c0_63] : memref<1x128xf32, #tpu.memory_space<vmem>>, vector<1x128xf32>
      %261 = vector.broadcast %260 : vector<1x128xf32> to vector<8x128xf32>
      %262 = arith.addf %259, %261 : vector<8x128xf32>
      %cst_64 = arith.constant dense<0xFF800000> : vector<8xf32>
      %263 = vector.multi_reduction <maximumf>, %262, %cst_64 [1] : vector<8x128xf32> to vector<8xf32>
      %264 = vector.shape_cast %263 : vector<8xf32> to vector<8x1xf32>
      %265 = vector.broadcast %264 : vector<8x1xf32> to vector<8x128xf32>
      %266 = arith.subf %262, %265 : vector<8x128xf32>
      %267 = math.exp %266 : vector<8x128xf32>
      %cst_65 = arith.constant dense<0.000000e+00> : vector<8xf32>
      %268 = vector.multi_reduction <add>, %267, %cst_65 [1] : vector<8x128xf32> to vector<8xf32>
      %269 = vector.shape_cast %268 : vector<8xf32> to vector<8x1xf32>
      %270 = math.log %269 : vector<8x1xf32>
      %271 = vector.broadcast %270 : vector<8x1xf32> to vector<8x128xf32>
      %272 = arith.subf %266, %271 : vector<8x128xf32>
      %c0_66 = arith.constant 0 : index
      %c0_67 = arith.constant 0 : index
      %273 = vector.load %arg11[%c0_66, %c0_67] : memref<8x128xf32, #tpu.memory_space<vmem>>, vector<8x128xf32>
      tpu.vector_store %arg11[%c0_66, %c0_67], %272 {strides = array<i32>} : memref<8x128xf32, #tpu.memory_space<vmem>>, vector<8x128xf32>,
    } else {
    }
    return
  }
  func.func @transform_0(%arg0: i32, %arg1: i32) -> (i32, i32, i32) {
    %c0_i32 = arith.constant 0 : i32
    %c0_i32_0 = arith.constant 0 : i32
    return %arg1, %arg0, %c0_i32 : i32, i32, i32
  }
  func.func @transform_1(%arg0: i32, %arg1: i32) -> (i32, i32) {
    %c0_i32 = arith.constant 0 : i32
    %c0_i32_0 = arith.constant 0 : i32
    return %arg0, %c0_i32 : i32, i32
  }
  func.func @transform_2(%arg0: i32, %arg1: i32) -> (i32, i32) {
    %c0_i32 = arith.constant 0 : i32
    %c0_i32_0 = arith.constant 0 : i32
    %c0_i32_1 = arith.constant 0 : i32
    return %c0_i32, %c0_i32_0 : i32, i32
  }
  func.func @transform_3(%arg0: i32, %arg1: i32) -> (i32, i32) {
    %c0_i32 = arith.constant 0 : i32
    %c0_i32_0 = arith.constant 0 : i32
    %c0_i32_1 = arith.constant 0 : i32
    return %c0_i32, %c0_i32_0 : i32, i32
  }
  func.func @transform_4(%arg0: i32, %arg1: i32) -> (i32, i32) {
    %c0_i32 = arith.constant 0 : i32
    %c0_i32_0 = arith.constant 0 : i32
    %c0_i32_1 = arith.constant 0 : i32
    return %c0_i32, %c0_i32_0 : i32, i32
  }
  func.func @transform_5(%arg0: i32, %arg1: i32) -> (i32, i32) {
    %c0_i32 = arith.constant 0 : i32
    %c0_i32_0 = arith.constant 0 : i32
    return %arg0, %c0_i32 : i32, i32
  }
  func.func @transform_6(%arg0: i32, %arg1: i32) -> (i32, i32) {
    %c0_i32 = arith.constant 0 : i32
    %c0_i32_0 = arith.constant 0 : i32
    return %arg0, %c0_i32 : i32, i32
  }
  func.func @transform_7(%arg0: i32, %arg1: i32) -> (i32, i32) {
    %c0_i32 = arith.constant 0 : i32
    %c0_i32_0 = arith.constant 0 : i32
    %c0_i32_1 = arith.constant 0 : i32
    return %c0_i32, %c0_i32_0 : i32, i32
  }
  func.func @transform_8(%arg0: i32, %arg1: i32) -> (i32, i32) {
    %c0_i32 = arith.constant 0 : i32
    %c0_i32_0 = arith.constant 0 : i32
    %c0_i32_1 = arith.constant 0 : i32
    return %c0_i32, %c0_i32_0 : i32, i32
  }
  func.func @transform_9(%arg0: i32, %arg1: i32) -> (i32, i32) {
    %c0_i32 = arith.constant 0 : i32
    %c0_i32_0 = arith.constant 0 : i32
    return %arg0, %c0_i32 : i32, i32
  }
}

</mosaic_0001>

<bundles_post_ra>
// kernel: lstm_classifier_forward.1
= control target key start
LH: loop header
LB: loop body
LE: loop exit
PB: predicated region body
PF: predicated region fallthrough
CT: control target
= control target key end

     0   :  { %14 = vsyncpa [#allocation5], 0  ;;  %s3642_s0 = inlined_call_operand.hbm [shape: bf16[8,8,16], index: 0, kind: input, shape index: {}]   ;;  %s3643_s1 = inlined_call_operand.hbm [shape: s32[8,1], index: 1, kind: input, shape index: {}]   ;;  %s3644_s2 = inlined_call_operand.hbm [shape: bf16[16,512], index: 2, kind: input, shape index: {}]   ;;  %s3645_s3 = inlined_call_operand.hbm [shape: f32[1,512], index: 3, kind: input, shape index: {}]   ;;  %s3646_s4 = inlined_call_operand.hbm [shape: bf16[128,512], index: 4, kind: input, shape index: {}]   ;;  %s3647_s5 = inlined_call_operand.hbm [shape: f32[8,128], index: 5, kind: input, shape index: {}]   ;;  %s3648_s6 = inlined_call_operand.hbm [shape: f32[8,128], index: 6, kind: input, shape index: {}]   ;;  %s3649_s7 = inlined_call_operand.hbm [shape: bf16[128,128], index: 7, kind: input, shape index: {}]   ;;  %s3650_s8 = inlined_call_operand.hbm [shape: f32[1,128], index: 8, kind: input, shape index: {}]   ;;  %s3651_s9 = inlined_call_operand.hbm [shape: f32[8,128], index: 9, kind: output, shape index: {}]  }
   0x1   :  { %15 = vsyncpa [#allocation8], 0 }
   0x2   :  { %16 = vsyncpa [#allocation11], 0 }
   0x3   :  { %17 = vsyncpa [#allocation14], 0 }
   0x4   :  { %18 = vsyncpa [#allocation17], 0 }
   0x5   :  { %19 = vsyncpa [#allocation6], 0  ;;  %s2863_s30 = smov [#allocation7]   ;;  %s2864_s11 = smov [#allocation10]  }
   0x6   :  { %s38_s10 = sshll.u32 %s2863_s30, 4  ;;  %s60_s12 = sshll.u32 %s2864_s11, 4  ;;  %s39_s10 = int_to_ptr.vmem [resolvable:$true] %s38_s10  ;;  %s61_s12 = int_to_ptr.vmem [resolvable:$true] %s60_s12 }
   0x7   :  { %s2631_s15 = scalar_lea.hbm %s3643_s1, 128 }
   0x8   :  { %p2632_p0 = scmp.ne.s32.totalorder %s3643_s1, %s2631_s15  ;;  %p2635_p1 = scmp.lt.u32.totalorder %s2631_s15, %s3643_s1 }
   0xa   :  { %p2637_p2 = pnand %p2635_p1, %p2632_p0 }
   0xc   :  { %2640 = shalt.err (!%p2637_p2)
}
   0xd   :  { %s2641_s20 = scalar_lea.vmem %s39_s10, 128  ;;  %p2646_p4 = scmp.lt.s32.totalorder %s39_s10, %s39_s10 }
   0xe   :  { %p2642_p3 = scmp.ne.s32.totalorder %s39_s10, %s2641_s20  ;;  %p2647_p5 = scmp.lt.s32.totalorder %s2641_s20, %s2641_s20 }
  0x10   :  { %p2648_p6 = por %p2647_p5, %p2646_p4 }
  0x12   :  { %p2649_p7 = pnand %p2648_p6, %p2642_p3 }
  0x14   :  { %2652 = shalt.err (!%p2649_p7)
}
  0x15   :  { %41 = dma.hbm_to_vmem [thread:$0]  %s3643_s1, 128, %s39_s10, [#allocation8]  }
  0x16   :  { %s2653_s25 = scalar_lea.hbm %s3645_s3, 64 }
  0x17   :  { %p2654_p8 = scmp.ne.s32.totalorder %s3645_s3, %s2653_s25  ;;  %p2657_p9 = scmp.lt.u32.totalorder %s2653_s25, %s3645_s3 }
  0x19   :  { %p2659_p10 = pnand %p2657_p9, %p2654_p8 }
  0x1b   :  { %2662 = shalt.err (!%p2659_p10)
}
  0x1c   :  { %s2663_s30 = scalar_lea.vmem %s61_s12, 64  ;;  %p2668_p12 = scmp.lt.s32.totalorder %s61_s12, %s61_s12 }
  0x1d   :  { %p2664_p11 = scmp.ne.s32.totalorder %s61_s12, %s2663_s30  ;;  %p2669_p13 = scmp.lt.s32.totalorder %s2663_s30, %s2663_s30 }
  0x1f   :  { %p2670_p0 = por %p2669_p13, %p2668_p12 }
  0x21   :  { %p2671_p1 = pnand %p2670_p0, %p2664_p11 }
  0x23   :  { %2674 = shalt.err (!%p2671_p1)
}
  0x24   :  { %63 = dma.hbm_to_vmem [thread:$0]  %s3645_s3, 64, %s61_s12, [#allocation11]  }
  0x25   :  { %s2865_s11 = smov [#allocation13]   ;;  %s2675_s16 = scalar_lea.hbm %s3647_s5, 128 }
  0x26   :  { %s82_s13 = sshll.u32 %s2865_s11, 4  ;;  %p2676_p2 = scmp.ne.s32.totalorder %s3647_s5, %s2675_s16  ;;  %s83_s13 = int_to_ptr.vmem [resolvable:$true] %s82_s13 }
  0x27   :  { %p2679_p3 = scmp.lt.u32.totalorder %s2675_s16, %s3647_s5 }
  0x29   :  { %p2681_p4 = pnand %p2679_p3, %p2676_p2 }
  0x2b   :  { %2684 = shalt.err (!%p2681_p4)
}
  0x2c   :  { %s2685_s21 = scalar_lea.vmem %s83_s13, 128  ;;  %p2690_p6 = scmp.lt.s32.totalorder %s83_s13, %s83_s13 }
  0x2d   :  { %p2686_p5 = scmp.ne.s32.totalorder %s83_s13, %s2685_s21  ;;  %p2691_p7 = scmp.lt.s32.totalorder %s2685_s21, %s2685_s21 }
  0x2f   :  { %p2692_p8 = por %p2691_p7, %p2690_p6 }
  0x31   :  { %p2693_p9 = pnand %p2692_p8, %p2686_p5 }
  0x33   :  { %2696 = shalt.err (!%p2693_p9)
}
  0x34   :  { %85 = dma.hbm_to_vmem [thread:$0]  %s3647_s5, 128, %s83_s13, [#allocation14]  }
  0x35   :  { %s2866_s22 = smov [#allocation16]   ;;  %s2867_s24 = smov [#allocation4]  }
  0x36   :  { %s101_s23 = sshll.u32 %s2866_s22, 4  ;;  %s25_s25 = sshll.u32 %s2867_s24, 4  ;;  %s102_s23 = int_to_ptr.vmem [resolvable:$true] %s101_s23  ;;  %s26_s25 = int_to_ptr.vmem [resolvable:$true] %s25_s25 }
  0x37   :  { %s2697_s28 = scalar_lea.hbm %s3649_s7, 1024 }
  0x38   :  { %p2698_p10 = scmp.ne.s32.totalorder %s3649_s7, %s2697_s28  ;;  %p2701_p11 = scmp.lt.u32.totalorder %s2697_s28, %s3649_s7 }
  0x3a   :  { %p2703_p12 = pnand %p2701_p11, %p2698_p10 }
  0x3c   :  { %2706 = shalt.err (!%p2703_p12)
}
  0x3d   :  { %s2707_s5 = scalar_lea.vmem %s102_s23, 1024  ;;  %p2712_p0 = scmp.lt.s32.totalorder %s102_s23, %s102_s23 }
  0x3e   :  { %p2708_p13 = scmp.ne.s32.totalorder %s102_s23, %s2707_s5  ;;  %p2713_p1 = scmp.lt.s32.totalorder %s2707_s5, %s2707_s5 }
  0x40   :  { %p2714_p2 = por %p2713_p1, %p2712_p0 }
  0x42   :  { %p2715_p3 = pnand %p2714_p2, %p2708_p13 }
  0x44   :  { %2718 = shalt.err (!%p2715_p3)
}
  0x45   :  { %s2868_s11 = smov 64   ;;  %s2869_s13 = smov 4  }
  0x46   :  { %107 = dma.hbm_to_vmem [thread:$0]  %s3649_s7, 1024, %s102_s23, [#allocation17], %s2868_s11, %s2868_s11, %s2869_s13  }
  0x47   :  { %s2719_s18 = scalar_lea.hbm %s3642_s0, 512 }
  0x48   :  { %p2720_p4 = scmp.ne.s32.totalorder %s3642_s0, %s2719_s18  ;;  %p2723_p5 = scmp.lt.u32.totalorder %s2719_s18, %s3642_s0 }
  0x4a   :  { %p2725_p6 = pnand %p2723_p5, %p2720_p4 }
  0x4c   :  { %2728 = shalt.err (!%p2725_p6)
}
  0x4d   :  { %s2729_s12 = scalar_lea.vmem %s26_s25, 512  ;;  %p2734_p8 = scmp.lt.s32.totalorder %s26_s25, %s26_s25 }
  0x4e   :  { %p2730_p7 = scmp.ne.s32.totalorder %s26_s25, %s2729_s12  ;;  %p2735_p9 = scmp.lt.s32.totalorder %s2729_s12, %s2729_s12 }
  0x50   :  { %p2736_p10 = por %p2735_p9, %p2734_p8 }
  0x52   :  { %p2737_p11 = pnand %p2736_p10, %p2730_p7 }
  0x54   :  { %2740 = shalt.err (!%p2737_p11)
}
  0x55   :  { %31 = dma.hbm_to_vmem [thread:$0]  %s3642_s0, 512, %s26_s25, [#allocation5], %s2868_s11, %s2868_s11, %s2869_s13  }
  0x56   :  { %s2870_s23 = smov [#allocation9]   ;;  %s2741_s28 = scalar_lea.hbm %s3644_s2, 512 }
  0x57   :  { %s47_s24 = sshll.u32 %s2870_s23, 4  ;;  %p2742_p12 = scmp.ne.s32.totalorder %s3644_s2, %s2741_s28  ;;  %s48_s24 = int_to_ptr.vmem [resolvable:$true] %s47_s24 }
  0x58   :  { %p2745_p13 = scmp.lt.u32.totalorder %s2741_s28, %s3644_s2 }
  0x5a   :  { %p2747_p0 = pnand %p2745_p13, %p2742_p12 }
  0x5c   :  { %2750 = shalt.err (!%p2747_p0)
}
  0x5d   :  { %s2751_s5 = scalar_lea.vmem %s48_s24, 512  ;;  %p2756_p2 = scmp.lt.s32.totalorder %s48_s24, %s48_s24 }
  0x5e   :  { %p2752_p1 = scmp.ne.s32.totalorder %s48_s24, %s2751_s5  ;;  %p2757_p3 = scmp.lt.s32.totalorder %s2751_s5, %s2751_s5 }
  0x60   :  { %p2758_p4 = por %p2757_p3, %p2756_p2 }
  0x62   :  { %p2759_p5 = pnand %p2758_p4, %p2752_p1 }
  0x64   :  { %2762 = shalt.err (!%p2759_p5)
}
  0x65   :  { %s2871_s0 = smov 256   ;;  %s2872_s25 = smov 16  }
  0x66   :  { %53 = dma.hbm_to_vmem [thread:$0]  %s3644_s2, 512, %s48_s24, [#allocation8], %s2871_s0, %s2871_s0, %s2872_s25  }
  0x67   :  { %s2873_s14 = smov [#allocation12]   ;;  %s2874_s16 = smov [#allocation15]  }
  0x68   :  { %s69_s15 = sshll.u32 %s2873_s14, 4  ;;  %s92_s17 = sshll.u32 %s2874_s16, 4  ;;  %s70_s15 = int_to_ptr.vmem [resolvable:$true] %s69_s15  ;;  %s93_s17 = int_to_ptr.vmem [resolvable:$true] %s92_s17 }
  0x69   :  { %s2763_s20 = scalar_lea.hbm %s3646_s4, 4096 }
  0x6a   :  { %p2764_p6 = scmp.ne.s32.totalorder %s3646_s4, %s2763_s20  ;;  %p2767_p7 = scmp.lt.u32.totalorder %s2763_s20, %s3646_s4 }
  0x6c   :  { %p2769_p8 = pnand %p2767_p7, %p2764_p6 }
  0x6e   :  { %2772 = shalt.err (!%p2769_p8)
}
  0x6f   :  { %s2773_s2 = scalar_lea.vmem %s70_s15, 4096  ;;  %p2778_p10 = scmp.lt.s32.totalorder %s70_s15, %s70_s15 }
  0x70   :  { %p2774_p9 = scmp.ne.s32.totalorder %s70_s15, %s2773_s2  ;;  %p2779_p11 = scmp.lt.s32.totalorder %s2773_s2, %s2773_s2 }
  0x72   :  { %p2780_p12 = por %p2779_p11, %p2778_p10 }
  0x74   :  { %p2781_p13 = pnand %p2780_p12, %p2774_p9 }
  0x76   :  { %2784 = shalt.err (!%p2781_p13)
}
  0x77   :  { %75 = dma.hbm_to_vmem [thread:$0]  %s3646_s4, 4096, %s70_s15, [#allocation11], %s2871_s0, %s2871_s0, %s2872_s25  }
  0x78   :  { %s2785_s27 = scalar_lea.hbm %s3648_s6, 128 }
  0x79   :  { %p2786_p0 = scmp.ne.s32.totalorder %s3648_s6, %s2785_s27  ;;  %p2789_p1 = scmp.lt.u32.totalorder %s2785_s27, %s3648_s6 }
  0x7b   :  { %p2791_p2 = pnand %p2789_p1, %p2786_p0 }
  0x7d   :  { %2794 = shalt.err (!%p2791_p2)
}
  0x7e   :  { %s2795_s10 = scalar_lea.vmem %s93_s17, 128  ;;  %p2800_p4 = scmp.lt.s32.totalorder %s93_s17, %s93_s17 }
  0x7f   :  { %p2796_p3 = scmp.ne.s32.totalorder %s93_s17, %s2795_s10  ;;  %p2801_p5 = scmp.lt.s32.totalorder %s2795_s10, %s2795_s10 }
  0x81   :  { %p2802_p6 = por %p2801_p5, %p2800_p4 }
  0x83   :  { %p2803_p7 = pnand %p2802_p6, %p2796_p3 }
  0x85   :  { %2806 = shalt.err (!%p2803_p7)
}
  0x86   :  { %95 = dma.hbm_to_vmem [thread:$0]  %s3648_s6, 128, %s93_s17, [#allocation14]  }
  0x87   :  { %s2875_s0 = smov [#allocation18]   ;;  %s2807_s14 = scalar_lea.hbm %s3650_s8, 16 }
  0x88   :  { %s114_s25 = sshll.u32 %s2875_s0, 4  ;;  %p2808_p8 = scmp.ne.s32.totalorder %s3650_s8, %s2807_s14  ;;  %s115_s25 = int_to_ptr.vmem [resolvable:$true] %s114_s25 }
  0x89   :  { %p2811_p9 = scmp.lt.u32.totalorder %s2807_s14, %s3650_s8 }
  0x8b   :  { %p2813_p10 = pnand %p2811_p9, %p2808_p8 }
  0x8d   :  { %2816 = shalt.err (!%p2813_p10)
}
  0x8e   :  { %s2817_s20 = scalar_lea.vmem %s115_s25, 16  ;;  %s2821_s6 = scalar_lea.vmem %s115_s25, 32 }
  0x8f   :  { %p2818_p11 = scmp.ne.s32.totalorder %s115_s25, %s2817_s20  ;;  %p2822_p12 = scmp.lt.s32.totalorder %s115_s25, %s115_s25 }
  0x90   :  { %p2823_p13 = scmp.lt.s32.totalorder %s2821_s6, %s2817_s20 }
  0x92   :  { %p2824_p0 = por %p2823_p13, %p2822_p12 }
  0x94   :  { %p2825_p1 = pnand %p2824_p0, %p2818_p11 }
  0x96   :  { %2828 = shalt.err (!%p2825_p1)
}
  0x97   :  { %117 = dma.hbm_to_vmem [thread:$0]  %s3650_s8, 16, %s115_s25, [#allocation17]  }
  0x98   :  { %2851 = dma.done.wait [#allocation5], 512  }
  0x99   :  { %2852 = vsyncadd [#allocation5], 4294966784 }
  0x9a   :  { %2853 = dma.done.wait [#allocation8], 640  }
  0x9b   :  { %2854 = vsyncadd [#allocation8], 4294966656 }
  0x9c   :  { %2855 = dma.done.wait [#allocation11], 4160  }
  0x9d   :  { %2856 = vsyncadd [#allocation11], 4294963136 }
  0x9e   :  { %2857 = dma.done.wait [#allocation14], 256  }
  0x9f   :  { %2858 = vsyncadd [#allocation14], 4294967040 }
  0xa0   :  { %2859 = dma.done.wait [#allocation17], 1040  }
  0xa1   :  { %2860 = vsyncadd [#allocation17], 4294966256  ;;  %v2876_v0 = vmov 0   ;;  %v3041_v1 = vld [vmem:[#allocation9 + $0x4] ss:$16 sps:$4 sm:$0xff]   ;;  %vm240_vm0 = vcmask 130048   ;;  %v200_v42 = vlaneseq }
  0xa2   :  { %276 = vmatprep.mubr.bf16.mxu0 %v2876_v0  ;;  %317 = vmatprep.mubr.bf16.mxu1 %v2876_v0  ;;  %v3043_v2 = vld [vmem:[#allocation9 + $0xc] ss:$16 sps:$4 sm:$0xff]   ;;  %v3046_v3 = vld [vmem:[#allocation9] ss:$16 sps:$4 sm:$0xff]   ;;  %v3048_v4 = vld [vmem:[#allocation9 + $0x8] ss:$16 sps:$4 sm:$0xff]  }
  0xa3   :  { %2400 = vset.pattern.permute.xlu0 %v2876_v0  ;;  %244 = vmatprep.subr.bf16.mxu0 %v3041_v1  ;;  %v3051_v5 = vld [vmem:[#allocation12 + $0x4] ss:$16 sps:$4 sm:$0xff]   ;;  %v3055_v6 = vld [vmem:[#allocation12 + $0xc] ss:$16 sps:$4 sm:$0xff]   ;;  %v3058_v8 = vld [vmem:[#allocation12] ss:$16 sps:$4 sm:$0xff]  }
  0xa4   :  { %285 = vmatprep.subr.bf16.mxu1 %v3043_v2  ;;  %245 = vmatpush1.bf16.msra.mxu0 %v3046_v3  ;;  %v198_v7 = vld [vmem:[#allocation4] sm:$0xf]  ;;  %v3060_v9 = vld [vmem:[#allocation12 + $0x8] ss:$16 sps:$4 sm:$0xff]   ;;  %v3067_v11 = vld [vmem:[#allocation12 + $0x2c] ss:$16 sps:$4 sm:$0xff]  }
  0xa5   :  { %286 = vmatpush1.bf16.msra.mxu1 %v3048_v4  ;;  %487 = vmatprep.subr.bf16.mxu0 %v3051_v5  ;;  %v3063_v10 = vld [vmem:[#allocation12 + $0x24] ss:$16 sps:$4 sm:$0xff]   ;;  %v3069_v12 = vld [vmem:[#allocation12 + $0x20] ss:$16 sps:$4 sm:$0xff]   ;;  %v3073_v13 = vld [vmem:[#allocation12 + $0x28] ss:$16 sps:$4 sm:$0xff]  }
  0xa6   :  { %528 = vmatprep.subr.bf16.mxu1 %v3055_v6  ;;  %v3077_v14 = vld [vmem:[#allocation12 + $0x44] ss:$16 sps:$4 sm:$0xff]   ;;  %v3079_v15 = vld [vmem:[#allocation12 + $0x4c] ss:$16 sps:$4 sm:$0xff]   ;;  %v3083_v16 = vld [vmem:[#allocation12 + $0x40] ss:$16 sps:$4 sm:$0xff]  }
  0xa7   :  { %2173 = vmatmul.mubr.msk.bf16.vlgmr.msra.gmra.mrb[0].mxu0 %vm240_vm0, %v198_v7  ;;  %v3087_v17 = vld [vmem:[#allocation12 + $0x48] ss:$16 sps:$4 sm:$0xff]   ;;  %v3091_v18 = vld [vmem:[#allocation12 + $0x64] ss:$16 sps:$4 sm:$0xff]   ;;  %v3093_v19 = vld [vmem:[#allocation12 + $0x6c] ss:$16 sps:$4 sm:$0xff]  }
  0xa8   :  { %2174 = vmatmul.mubr.msk.bf16.vlgmr.msra.gmra.mrb[0].mxu1 %vm240_vm0, %v198_v7  ;;  %488 = vmatpush1.bf16.msra.mxu0 %v3058_v8  ;;  %v3095_v20 = vld [vmem:[#allocation12 + $0x60] ss:$16 sps:$4 sm:$0xff]   ;;  %v3097_v21 = vld [vmem:[#allocation12 + $0x68] ss:$16 sps:$4 sm:$0xff]   ;;  %v3101_v22 = vld [vmem:[#allocation12 + $0x84] ss:$16 sps:$4 sm:$0xff]  }
  0xa9   :  { %529 = vmatpush1.bf16.msra.mxu1 %v3060_v9  ;;  %489 = vmatprep.subr.bf16.mxu0 %v3063_v10  ;;  %v3105_v23 = vld [vmem:[#allocation12 + $0x8c] ss:$16 sps:$4 sm:$0xff]   ;;  %v3107_v24 = vld [vmem:[#allocation12 + $0x80] ss:$16 sps:$4 sm:$0xff]   ;;  %v3111_v25 = vld [vmem:[#allocation12 + $0x88] ss:$16 sps:$4 sm:$0xff]  }
  0xaa   :  { %530 = vmatprep.subr.bf16.mxu1 %v3067_v11  ;;  %519 = vmatprep.mubr.bf16.mxu0 %v2876_v0  ;;  %v3115_v26 = vld [vmem:[#allocation12 + $0xa4] ss:$16 sps:$4 sm:$0xff]   ;;  %v3117_v27 = vld [vmem:[#allocation12 + $0xac] ss:$16 sps:$4 sm:$0xff]   ;;  %v3119_v28 = vld [vmem:[#allocation12 + $0xa0] ss:$16 sps:$4 sm:$0xff]  }
  0xab   :  { %560 = vmatprep.mubr.bf16.mxu1 %v2876_v0  ;;  %v3123_v29 = vld [vmem:[#allocation12 + $0xa8] ss:$16 sps:$4 sm:$0xff]   ;;  %v3125_v30 = vld [vmem:[#allocation12 + $0xc4] ss:$16 sps:$4 sm:$0xff]   ;;  %v3129_v32 = vld [vmem:[#allocation12 + $0xcc] ss:$16 sps:$4 sm:$0xff]  }
  0xac   :  { %490 = vmatpush1.bf16.msra.mxu0 %v3069_v12  ;;  %v192_v31 = vld [vmem:[#allocation7] sm:$0xff]  ;;  %v3131_v33 = vld [vmem:[#allocation12 + $0xc0] ss:$16 sps:$4 sm:$0xff]   ;;  %v3137_v36 = vld [vmem:[#allocation12 + $0xec] ss:$16 sps:$4 sm:$0xff]   ;;  %v201_v43 = vshrl.u32 %v200_v42, 7 }
  0xad   :  { %531 = vmatpush1.bf16.msra.mxu1 %v3073_v13  ;;  %491 = vmatprep.subr.bf16.mxu0 %v3077_v14  ;;  %v3133_v34 = vld [vmem:[#allocation12 + $0xc8] ss:$16 sps:$4 sm:$0xff]   ;;  %v3135_v35 = vld [vmem:[#allocation12 + $0xe4] ss:$16 sps:$4 sm:$0xff]   ;;  %v3145_v37 = vld [vmem:[#allocation12 + $0xe0] ss:$16 sps:$4 sm:$0xff]  }
  0xae   :  { %532 = vmatprep.subr.bf16.mxu1 %v3079_v15  ;;  %194 = vperm.xlu0 %2400, %v192_v31   ;;  %v3147_v38 = vld [vmem:[#allocation12 + $0xe8] ss:$16 sps:$4 sm:$0xff]   ;;  %v3149_v39 = vld [vmem:[#allocation13] sm:$0xff]  ;;  %v202_v44 = vsub.s32 0, %v201_v43  ;;  %v191_v45 = vld [vmem:[#allocation10] sm:$0xf] }
  0xaf   :  { %v326_v40 = vpack.c.bf16 %v3149_v39, %v3149_v39  ;;  %v602_v41 = vld [vmem:[#allocation4 + $0x4] sm:$0xf]  ;;  %v206_v46 = vsub.s32 1, %v201_v43  ;;  %v210_v52 = vsub.s32 2, %v201_v43  ;;  %v214_v62 = vsub.s32 3, %v201_v43  ;;  %s2879_s8 = smov [#allocation19]  }
  0xb0   :  { %492 = vmatpush1.bf16.msra.mxu0 %v3083_v16  ;;  %v3201_v47 = vrot.slane %v191_v45, %v202_v44  ;;  %vm2878_vm8 = vmmov 0   ;;  %s2156_s3 = sshll.u32 %s2879_s8, 4  ;;  %s2157_s3 = int_to_ptr.vmem [resolvable:$true] %s2156_s3 }
  0xb1   :  { %533 = vmatpush1.bf16.msra.mxu1 %v3087_v17  ;;  %493 = vmatprep.subr.bf16.mxu0 %v3091_v18  ;;  %v3203_v48 = vrot.slane %v191_v45, %v206_v46  ;;  %v3207_v63 = vrot.slane %v191_v45, %v210_v52  ;;  %v3209_v7 = vrot.slane %v191_v45, %v214_v62  ;;  %s2829_s12 = scalar_lea.vmem %s2157_s3, 128  ;;  %p2834_p3 = scmp.lt.s32.totalorder %s2157_s3, %s2157_s3 }
  0xb2   :  { %534 = vmatprep.subr.bf16.mxu1 %v3093_v19  ;;  %p2830_p2 = scmp.ne.s32.totalorder %s2157_s3, %s2829_s12  ;;  %p2835_p4 = scmp.lt.s32.totalorder %s2829_s12, %s2829_s12 }
  0xb4   :  { %494 = vmatpush1.bf16.msra.mxu0 %v3095_v20  ;;  %p2836_p5 = por %p2835_p4, %p2834_p3 }
  0xb5   :  { %535 = vmatpush1.bf16.msra.mxu1 %v3097_v21  ;;  %495 = vmatprep.subr.bf16.mxu0 %v3101_v22 }
  0xb6   :  { %536 = vmatprep.subr.bf16.mxu1 %v3105_v23  ;;  %p2837_p6 = pnand %p2836_p5, %p2830_p2 }
  0xb8   :  { %496 = vmatpush1.bf16.msra.mxu0 %v3107_v24 }
  0xb9   :  { %537 = vmatpush1.bf16.msra.mxu1 %v3111_v25  ;;  %497 = vmatprep.subr.bf16.mxu0 %v3115_v26 }
  0xba   :  { %538 = vmatprep.subr.bf16.mxu1 %v3117_v27 }
  0xbc   :  { %498 = vmatpush1.bf16.msra.mxu0 %v3119_v28 }
  0xbd   :  { %539 = vmatpush1.bf16.msra.mxu1 %v3123_v29  ;;  %499 = vmatprep.subr.bf16.mxu0 %v3125_v30 }
  0xbe   :  { %540 = vmatprep.subr.bf16.mxu1 %v3129_v32 }
  0xc0   :  { %500 = vmatpush1.bf16.msra.mxu0 %v3131_v33 }
  0xc1   :  { %541 = vmatpush1.bf16.msra.mxu1 %v3133_v34  ;;  %501 = vmatprep.subr.bf16.mxu0 %v3135_v35 }
  0xc2   :  { %542 = vmatprep.subr.bf16.mxu1 %v3137_v36 }
  0xc4   :  { %502 = vmatpush1.bf16.msra.mxu0 %v3145_v37 }
  0xc5   :  { %543 = vmatpush1.bf16.msra.mxu1 %v3147_v38  ;;  %689 = vmatprep.subr.bf16.mxu0 %v3051_v5 }
  0xc6   :  { %606 = vmatprep.subr.bf16.mxu1 %v3041_v1 }
  0xc7   :  { %520 = vmatmul.mubr.bf16.vlgmr.msra.gmra.mrb[0].mxu0 %v326_v40 }
  0xc8   :  { %561 = vmatmul.mubr.bf16.vlgmr.msra.gmra.mrb[0].mxu1 %v326_v40  ;;  %690 = vmatpush1.bf16.msra.mxu0 %v3058_v8 }
  0xc9   :  { %607 = vmatpush1.bf16.msra.mxu1 %v3046_v3  ;;  %638 = vmatprep.mubr.bf16.mxu1 %v2876_v0 }
  0xca   :  { %647 = vmatprep.subr.bf16.mxu1 %v3043_v2  ;;  %691 = vmatprep.subr.bf16.mxu0 %v3063_v10 }
  0xcb   :  { %721 = vmatprep.mubr.bf16.mxu0 %v2876_v0 }
  0xcc   :  { %692 = vmatpush1.bf16.msra.mxu0 %v3069_v12 }
  0xcd   :  { %693 = vmatprep.subr.bf16.mxu0 %v3077_v14 }
  0xd0   :  { %694 = vmatpush1.bf16.msra.mxu0 %v3083_v16  ;;  %2211 = vmatmul.mubr.msk.bf16.vlgmr.msra.gmra.mrb[4].mxu1 %vm240_vm0, %v602_v41 }
  0xd1   :  { %695 = vmatprep.subr.bf16.mxu0 %v3091_v18  ;;  %648 = vmatpush1.bf16.msra.mxu1 %v3048_v4 }
  0xd2   :  { %679 = vmatprep.mubr.bf16.mxu1 %v2876_v0  ;;  %730 = vmatprep.subr.bf16.mxu1 %v3055_v6 }
  0xd4   :  { %696 = vmatpush1.bf16.msra.mxu0 %v3095_v20 }
  0xd5   :  { %697 = vmatprep.subr.bf16.mxu0 %v3101_v22 }
  0xd8   :  { %698 = vmatpush1.bf16.msra.mxu0 %v3107_v24  ;;  %2212 = vmatmul.mubr.msk.bf16.vlgmr.msra.gmra.mrb[8].mxu1 %vm240_vm0, %v602_v41 }
  0xd9   :  { %699 = vmatprep.subr.bf16.mxu0 %v3115_v26  ;;  %731 = vmatpush1.bf16.msra.mxu1 %v3060_v9 }
  0xda   :  { %762 = vmatprep.mubr.bf16.mxu1 %v2876_v0  ;;  %732 = vmatprep.subr.bf16.mxu1 %v3067_v11 }
  0xdc   :  { %700 = vmatpush1.bf16.msra.mxu0 %v3119_v28 }
  0xdd   :  { %701 = vmatprep.subr.bf16.mxu0 %v3125_v30  ;;  %733 = vmatpush1.bf16.msra.mxu1 %v3073_v13 }
  0xde   :  { %734 = vmatprep.subr.bf16.mxu1 %v3079_v15 }
  0xe0   :  { %702 = vmatpush1.bf16.msra.mxu0 %v3131_v33 }
  0xe1   :  { %703 = vmatprep.subr.bf16.mxu0 %v3135_v35  ;;  %735 = vmatpush1.bf16.msra.mxu1 %v3087_v17 }
  0xe2   :  { %736 = vmatprep.subr.bf16.mxu1 %v3093_v19 }
  0xe4   :  { %704 = vmatpush1.bf16.msra.mxu0 %v3145_v37 }
  0xe5   :  { %892 = vmatprep.subr.bf16.mxu0 %v3051_v5  ;;  %737 = vmatpush1.bf16.msra.mxu1 %v3097_v21 }
  0xe6   :  { %738 = vmatprep.subr.bf16.mxu1 %v3105_v23 }
  0xe9   :  { %739 = vmatpush1.bf16.msra.mxu1 %v3111_v25 }
  0xea   :  { %740 = vmatprep.subr.bf16.mxu1 %v3117_v27 }
  0xed   :  { %741 = vmatpush1.bf16.msra.mxu1 %v3123_v29 }
  0xee   :  { %742 = vmatprep.subr.bf16.mxu1 %v3129_v32 }
  0xf1   :  { %743 = vmatpush1.bf16.msra.mxu1 %v3133_v34 }
  0xf2   :  { %744 = vmatprep.subr.bf16.mxu1 %v3137_v36 }
  0xf5   :  { %745 = vmatpush1.bf16.msra.mxu1 %v3147_v38 }
  0xf6   :  { %809 = vmatprep.subr.bf16.mxu1 %v3041_v1 }
 0x12d   :  { %v3213_v45 = vpop.permute.xlu0 %194 }
 0x12e   :  { %vm2210_vm1 = vcmp.gt.s32.totalorder %v3213_v45, 0  ;;  %vm2216_vm2 = vcmp.gt.s32.totalorder %v3213_v45, 1  ;;  %vm2222_vm3 = vcmp.gt.s32.totalorder %v3213_v45, 2  ;;  %vm2228_vm4 = vcmp.gt.s32.totalorder %v3213_v45, 3 }
 0x12f   :  { %vm2234_vm5 = vcmp.gt.s32.totalorder %v3213_v45, 4  ;;  %vm2240_vm6 = vcmp.gt.s32.totalorder %v3213_v45, 5  ;;  %vm2246_vm7 = vcmp.gt.s32.totalorder %v3213_v45, 6  ;;  %vm2252_vm9 = vcmp.gt.s32.totalorder %v3213_v45, 7 }
 0x19a   :  { %v521_v49 = vpop.f32.mrb[0].mxu0 }
 0x19b   :  { %v562_v50 = vpop.f32.mrb[0].mxu1  ;;  %v2291_v51 = vadd.f32 %v521_v49, %v3201_v47  ;;  %v523_v53 = vpop.f32.mrb[1].mxu0 }
 0x19c   :  { %v564_v54 = vpop.f32.mrb[1].mxu1  ;;  %v2292_v55 = vadd.f32 %v523_v53, %v3203_v48  ;;  %v525_v56 = vpop.f32.mrb[2].mxu0  ;;  %v2293_v31 = vadd.f32 %v562_v50, %v3207_v63  ;;  %v153_v53 = vld [vmem:[#allocation15] sm:$0xff] }
 0x19d   :  { %v566_v57 = vpop.f32.mrb[2].mxu1  ;;  %v2207_v58 = vmul.f32 -1.442695, %v2291_v51  ;;  %v526_v59 = vpop.f32.mrb[3].mxu0  ;;  %v2294_v40 = vadd.f32 %v564_v54, %v3209_v7 }
 0x19e   :  { %v567_v60 = vpop.f32.mrb[3].mxu1  ;;  %v2208_v61 = vmul.f32 -1.442695, %v2292_v55  ;;  %v2209_v41 = vmul.f32 -1.442695, %v2293_v31 }
 0x19f   :  { %2463 = vpow2.f32 %v2207_v58 }
 0x1a0   :  { %2465 = vpow2.f32 %v2208_v61 }
 0x1a1   :  { %2467 = vtanh.f32 %v2294_v40 }
 0x1a2   :  { %2469 = vpow2.f32 %v2209_v41 }
 0x1a9   :  { %v2464_v42 = vpop.eup %2463 }
 0x1aa   :  { %v582_v44 = vadd.f32 1.0, %v2464_v42  ;;  %v2466_v46 = vpop.eup %2465 }
 0x1ab   :  { %v583_v49 = vadd.f32 1.0, %v2466_v46  ;;  %v2468_v43 = vpop.eup %2467 }
 0x1ac   :  { %2471 = vrcp.f32 %v582_v44  ;;  %v2470_v51 = vpop.eup %2469  ;;  %v805_v44 = vld [vmem:[#allocation4 + $0x8] sm:$0xf] }
 0x1ad   :  { %2473 = vrcp.f32 %v583_v49  ;;  %v584_v50 = vadd.f32 1.0, %v2470_v51 }
 0x1af   :  { %2475 = vrcp.f32 %v584_v50 }
 0x1b6   :  { %v2472_v52 = vpop.eup %2471 }
 0x1b7   :  { %v593_v55 = vmul.f32 %v2472_v52, %v2468_v43  ;;  %v2474_v56 = vpop.eup %2473 }
 0x1b8   :  { %v592_v57 = vmul.f32 %v2474_v56, %v153_v53 }
 0x1b9   :  { %v2476_v59 = vpop.eup %2475 }
 0x1ba   :  { %v594_v54 = vadd.f32 %v593_v55, %v592_v57 }
 0x1bc   :  { %2477 = vtanh.f32 %v594_v54  ;;  %v3216_v58 = vsel %vm2210_vm1, %v594_v54, %v153_v53 }
 0x1c6   :  { %v2478_v60 = vpop.eup %2477 }
 0x1c7   :  { %v596_v61 = vmul.f32 %v2478_v60, %v2476_v59 }
 0x1c9   :  { %v3219_v62 = vsel %vm2210_vm1, %v596_v61, %v3149_v39  ;;  %v640_v39 = vpop.f32.mrb[4].mxu1 }
 0x1ca   :  { %v688_v31 = vpack.c.bf16 %v3219_v62, %v3219_v62  ;;  %v642_v40 = vpop.f32.mrb[5].mxu1  ;;  %v641_v46 = vadd.f32 %v640_v39, %v3201_v47 }
 0x1cb   :  { %v644_v41 = vpop.f32.mrb[6].mxu1  ;;  %v643_v49 = vadd.f32 %v642_v40, %v3203_v48 }
 0x1cc   :  { %722 = vmatmul.mubr.bf16.vlgmr.msra.gmra.mrb[4].mxu0 %v688_v31  ;;  %763 = vmatmul.mubr.bf16.vlgmr.msra.gmra.mrb[8].mxu1 %v688_v31  ;;  %v645_v42 = vpop.f32.mrb[7].mxu1 }
 0x1cd   :  { %810 = vmatpush1.bf16.msra.mxu1 %v3046_v3  ;;  %841 = vmatprep.mubr.bf16.mxu1 %v2876_v0 }
 0x1ce   :  { %850 = vmatprep.subr.bf16.mxu1 %v3043_v2  ;;  %893 = vmatpush1.bf16.msra.mxu0 %v3058_v8 }
 0x1cf   :  { %894 = vmatprep.subr.bf16.mxu0 %v3063_v10  ;;  %924 = vmatprep.mubr.bf16.mxu0 %v2876_v0 }
 0x1d2   :  { %895 = vmatpush1.bf16.msra.mxu0 %v3069_v12 }
 0x1d3   :  { %896 = vmatprep.subr.bf16.mxu0 %v3077_v14 }
 0x1d4   :  { %2217 = vmatmul.mubr.msk.bf16.vlgmr.msra.gmra.mrb[12].mxu1 %vm240_vm0, %v805_v44 }
 0x1d5   :  { %851 = vmatpush1.bf16.msra.mxu1 %v3048_v4  ;;  %882 = vmatprep.mubr.bf16.mxu1 %v2876_v0 }
 0x1d6   :  { %897 = vmatpush1.bf16.msra.mxu0 %v3083_v16  ;;  %933 = vmatprep.subr.bf16.mxu1 %v3055_v6 }
 0x1d7   :  { %898 = vmatprep.subr.bf16.mxu0 %v3091_v18 }
 0x1da   :  { %899 = vmatpush1.bf16.msra.mxu0 %v3095_v20 }
 0x1db   :  { %900 = vmatprep.subr.bf16.mxu0 %v3101_v22 }
 0x1dc   :  { %2218 = vmatmul.mubr.msk.bf16.vlgmr.msra.gmra.mrb[16].mxu1 %vm240_vm0, %v805_v44 }
 0x1dd   :  { %934 = vmatpush1.bf16.msra.mxu1 %v3060_v9  ;;  %965 = vmatprep.mubr.bf16.mxu1 %v2876_v0 }
 0x1de   :  { %901 = vmatpush1.bf16.msra.mxu0 %v3107_v24  ;;  %935 = vmatprep.subr.bf16.mxu1 %v3067_v11 }
 0x1df   :  { %902 = vmatprep.subr.bf16.mxu0 %v3115_v26 }
 0x1e1   :  { %936 = vmatpush1.bf16.msra.mxu1 %v3073_v13 }
 0x1e2   :  { %903 = vmatpush1.bf16.msra.mxu0 %v3119_v28  ;;  %937 = vmatprep.subr.bf16.mxu1 %v3079_v15 }
 0x1e3   :  { %904 = vmatprep.subr.bf16.mxu0 %v3125_v30 }
 0x1e5   :  { %938 = vmatpush1.bf16.msra.mxu1 %v3087_v17 }
 0x1e6   :  { %905 = vmatpush1.bf16.msra.mxu0 %v3131_v33  ;;  %939 = vmatprep.subr.bf16.mxu1 %v3093_v19 }
 0x1e7   :  { %906 = vmatprep.subr.bf16.mxu0 %v3135_v35 }
 0x1e9   :  { %940 = vmatpush1.bf16.msra.mxu1 %v3097_v21 }
 0x1ea   :  { %907 = vmatpush1.bf16.msra.mxu0 %v3145_v37  ;;  %941 = vmatprep.subr.bf16.mxu1 %v3105_v23 }
 0x1eb   :  { %1012 = vmatprep.subr.bf16.mxu0 %v3041_v1 }
 0x1ed   :  { %942 = vmatpush1.bf16.msra.mxu1 %v3111_v25 }
 0x1ee   :  { %943 = vmatprep.subr.bf16.mxu1 %v3117_v27 }
 0x1f1   :  { %944 = vmatpush1.bf16.msra.mxu1 %v3123_v29 }
 0x1f2   :  { %945 = vmatprep.subr.bf16.mxu1 %v3129_v32 }
 0x1f5   :  { %946 = vmatpush1.bf16.msra.mxu1 %v3133_v34 }
 0x1f6   :  { %947 = vmatprep.subr.bf16.mxu1 %v3137_v36 }
 0x1f9   :  { %948 = vmatpush1.bf16.msra.mxu1 %v3147_v38 }
 0x1fa   :  { %1053 = vmatprep.subr.bf16.mxu1 %v3043_v2 }
 0x29f   :  { %v723_v43 = vpop.f32.mrb[4].mxu0  ;;  %v764_v51 = vpop.f32.mrb[8].mxu1 }
 0x2a0   :  { %v771_v52 = vadd.f32 %v723_v43, %v641_v46  ;;  %v725_v53 = vpop.f32.mrb[5].mxu0  ;;  %v766_v55 = vpop.f32.mrb[9].mxu1  ;;  %v2299_v31 = vadd.f32 %v764_v51, %v3207_v63 }
 0x2a1   :  { %v772_v56 = vadd.f32 %v725_v53, %v643_v49  ;;  %v727_v50 = vpop.f32.mrb[6].mxu0  ;;  %v768_v57 = vpop.f32.mrb[10].mxu1  ;;  %v2300_v39 = vadd.f32 %v766_v55, %v3209_v7 }
 0x2a2   :  { %v2213_v54 = vmul.f32 -1.442695, %v771_v52  ;;  %v728_v59 = vpop.f32.mrb[7].mxu0  ;;  %v769_v60 = vpop.f32.mrb[11].mxu1  ;;  %v2215_v41 = vmul.f32 -1.442695, %v2299_v31 }
 0x2a3   :  { %v2214_v61 = vmul.f32 -1.442695, %v772_v56 }
 0x2a4   :  { %2479 = vpow2.f32 %v2213_v54 }
 0x2a5   :  { %2481 = vpow2.f32 %v2214_v61 }
 0x2a6   :  { %2483 = vtanh.f32 %v2300_v39 }
 0x2a7   :  { %2485 = vpow2.f32 %v2215_v41 }
 0x2ae   :  { %v2480_v40 = vpop.eup %2479 }
 0x2af   :  { %v784_v42 = vadd.f32 1.0, %v2480_v40  ;;  %v2482_v44 = vpop.eup %2481  ;;  %v1008_v40 = vld [vmem:[#allocation4 + $0xc] sm:$0xf] }
 0x2b0   :  { %v785_v46 = vadd.f32 1.0, %v2482_v44  ;;  %v2484_v49 = vpop.eup %2483 }
 0x2b1   :  { %2487 = vrcp.f32 %v784_v42  ;;  %v2486_v43 = vpop.eup %2485 }
 0x2b2   :  { %2489 = vrcp.f32 %v785_v46  ;;  %v786_v50 = vadd.f32 1.0, %v2486_v43 }
 0x2b4   :  { %2491 = vrcp.f32 %v786_v50 }
 0x2bb   :  { %v2488_v52 = vpop.eup %2487 }
 0x2bc   :  { %v795_v53 = vmul.f32 %v2488_v52, %v2484_v49  ;;  %v2490_v56 = vpop.eup %2489 }
 0x2bd   :  { %v794_v57 = vmul.f32 %v2490_v56, %v3216_v58 }
 0x2be   :  { %v2492_v54 = vpop.eup %2491 }
 0x2bf   :  { %v796_v51 = vadd.f32 %v795_v53, %v794_v57 }
 0x2c1   :  { %2493 = vtanh.f32 %v796_v51  ;;  %v3272_v55 = vsel %vm2216_vm2, %v796_v51, %v3216_v58  ;;  %v843_v58 = vpop.f32.mrb[12].mxu1 }
 0x2c2   :  { %v844_v42 = vadd.f32 %v843_v58, %v3201_v47 }
 0x2cb   :  { %v2494_v59 = vpop.eup %2493 }
 0x2cc   :  { %v798_v60 = vmul.f32 %v2494_v59, %v2492_v54 }
 0x2ce   :  { %v3275_v61 = vsel %vm2216_vm2, %v798_v60, %v3219_v62  ;;  %v845_v62 = vpop.f32.mrb[13].mxu1 }
 0x2cf   :  { %v891_v31 = vpack.c.bf16 %v3275_v61, %v3275_v61  ;;  %v847_v39 = vpop.f32.mrb[14].mxu1  ;;  %v846_v44 = vadd.f32 %v845_v62, %v3203_v48 }
 0x2d0   :  { %v848_v41 = vpop.f32.mrb[15].mxu1 }
 0x2d1   :  { %925 = vmatmul.mubr.bf16.vlgmr.msra.gmra.mrb[8].mxu0 %v891_v31  ;;  %966 = vmatmul.mubr.bf16.vlgmr.msra.gmra.mrb[16].mxu1 %v891_v31 }
 0x2d2   :  { %1013 = vmatpush1.bf16.msra.mxu0 %v3046_v3  ;;  %1054 = vmatpush1.bf16.msra.mxu1 %v3048_v4 }
 0x2d3   :  { %1044 = vmatprep.mubr.bf16.mxu0 %v2876_v0  ;;  %1085 = vmatprep.mubr.bf16.mxu1 %v2876_v0 }
 0x2d4   :  { %1095 = vmatprep.subr.bf16.mxu0 %v3051_v5  ;;  %1136 = vmatprep.subr.bf16.mxu1 %v3055_v6 }
 0x2d9   :  { %2223 = vmatmul.mubr.msk.bf16.vlgmr.msra.gmra.mrb[12].mxu0 %vm240_vm0, %v1008_v40  ;;  %2224 = vmatmul.mubr.msk.bf16.vlgmr.msra.gmra.mrb[20].mxu1 %vm240_vm0, %v1008_v40 }
 0x2da   :  { %1096 = vmatpush1.bf16.msra.mxu0 %v3058_v8  ;;  %1137 = vmatpush1.bf16.msra.mxu1 %v3060_v9 }
 0x2db   :  { %1097 = vmatprep.subr.bf16.mxu0 %v3063_v10  ;;  %1138 = vmatprep.subr.bf16.mxu1 %v3067_v11 }
 0x2dc   :  { %1127 = vmatprep.mubr.bf16.mxu0 %v2876_v0  ;;  %1168 = vmatprep.mubr.bf16.mxu1 %v2876_v0 }
 0x2de   :  { %1098 = vmatpush1.bf16.msra.mxu0 %v3069_v12  ;;  %1139 = vmatpush1.bf16.msra.mxu1 %v3073_v13 }
 0x2df   :  { %1099 = vmatprep.subr.bf16.mxu0 %v3077_v14  ;;  %1140 = vmatprep.subr.bf16.mxu1 %v3079_v15 }
 0x2e2   :  { %1100 = vmatpush1.bf16.msra.mxu0 %v3083_v16  ;;  %1141 = vmatpush1.bf16.msra.mxu1 %v3087_v17 }
 0x2e3   :  { %1101 = vmatprep.subr.bf16.mxu0 %v3091_v18  ;;  %1142 = vmatprep.subr.bf16.mxu1 %v3093_v19 }
 0x2e6   :  { %1102 = vmatpush1.bf16.msra.mxu0 %v3095_v20  ;;  %1143 = vmatpush1.bf16.msra.mxu1 %v3097_v21 }
 0x2e7   :  { %1103 = vmatprep.subr.bf16.mxu0 %v3101_v22  ;;  %1144 = vmatprep.subr.bf16.mxu1 %v3105_v23 }
 0x2ea   :  { %1104 = vmatpush1.bf16.msra.mxu0 %v3107_v24  ;;  %1145 = vmatpush1.bf16.msra.mxu1 %v3111_v25 }
 0x2eb   :  { %1105 = vmatprep.subr.bf16.mxu0 %v3115_v26  ;;  %1146 = vmatprep.subr.bf16.mxu1 %v3117_v27 }
 0x2ee   :  { %1106 = vmatpush1.bf16.msra.mxu0 %v3119_v28  ;;  %1147 = vmatpush1.bf16.msra.mxu1 %v3123_v29 }
 0x2ef   :  { %1107 = vmatprep.subr.bf16.mxu0 %v3125_v30  ;;  %1148 = vmatprep.subr.bf16.mxu1 %v3129_v32 }
 0x2f2   :  { %1108 = vmatpush1.bf16.msra.mxu0 %v3131_v33  ;;  %1149 = vmatpush1.bf16.msra.mxu1 %v3133_v34 }
 0x2f3   :  { %1109 = vmatprep.subr.bf16.mxu0 %v3135_v35  ;;  %1150 = vmatprep.subr.bf16.mxu1 %v3137_v36 }
 0x2f6   :  { %1110 = vmatpush1.bf16.msra.mxu0 %v3145_v37  ;;  %1151 = vmatpush1.bf16.msra.mxu1 %v3147_v38 }
 0x2f7   :  { %1215 = vmatprep.subr.bf16.mxu0 %v3041_v1  ;;  %1256 = vmatprep.subr.bf16.mxu1 %v3043_v2 }
 0x3a4   :  { %v926_v46 = vpop.f32.mrb[8].mxu0  ;;  %v967_v49 = vpop.f32.mrb[16].mxu1 }
 0x3a5   :  { %v974_v43 = vadd.f32 %v926_v46, %v844_v42  ;;  %v928_v52 = vpop.f32.mrb[9].mxu0  ;;  %v969_v53 = vpop.f32.mrb[17].mxu1  ;;  %v2305_v31 = vadd.f32 %v967_v49, %v3207_v63 }
 0x3a6   :  { %v975_v56 = vadd.f32 %v928_v52, %v846_v44  ;;  %v930_v50 = vpop.f32.mrb[10].mxu0  ;;  %v971_v57 = vpop.f32.mrb[18].mxu1  ;;  %v2306_v58 = vadd.f32 %v969_v53, %v3209_v7 }
 0x3a7   :  { %v2219_v51 = vmul.f32 -1.442695, %v974_v43  ;;  %v931_v54 = vpop.f32.mrb[11].mxu0  ;;  %v972_v59 = vpop.f32.mrb[19].mxu1  ;;  %v2221_v39 = vmul.f32 -1.442695, %v2305_v31 }
 0x3a8   :  { %v2220_v60 = vmul.f32 -1.442695, %v975_v56 }
 0x3a9   :  { %2495 = vpow2.f32 %v2219_v51 }
 0x3aa   :  { %2497 = vpow2.f32 %v2220_v60 }
 0x3ab   :  { %2499 = vtanh.f32 %v2306_v58 }
 0x3ac   :  { %2501 = vpow2.f32 %v2221_v39 }
 0x3b3   :  { %v2496_v62 = vpop.eup %2495 }
 0x3b4   :  { %v987_v41 = vadd.f32 1.0, %v2496_v62  ;;  %v2498_v40 = vpop.eup %2497 }
 0x3b5   :  { %v988_v42 = vadd.f32 1.0, %v2498_v40  ;;  %v2500_v44 = vpop.eup %2499 }
 0x3b6   :  { %2503 = vrcp.f32 %v987_v41  ;;  %v2502_v46 = vpop.eup %2501 }
 0x3b7   :  { %2505 = vrcp.f32 %v988_v42  ;;  %v989_v50 = vadd.f32 1.0, %v2502_v46 }
 0x3b9   :  { %2507 = vrcp.f32 %v989_v50 }
 0x3c0   :  { %v2504_v43 = vpop.eup %2503 }
 0x3c1   :  { %v998_v52 = vmul.f32 %v2504_v43, %v2500_v44  ;;  %v2506_v56 = vpop.eup %2505 }
 0x3c2   :  { %v997_v57 = vmul.f32 %v2506_v56, %v3272_v55 }
 0x3c3   :  { %v2508_v51 = vpop.eup %2507 }
 0x3c4   :  { %v999_v49 = vadd.f32 %v998_v52, %v997_v57 }
 0x3c6   :  { %2509 = vtanh.f32 %v999_v49  ;;  %v3328_v53 = vsel %vm2222_vm3, %v999_v49, %v3272_v55  ;;  %v1211_v55 = vld [vmem:[#allocation4 + $0x10] sm:$0xf] }
 0x3d0   :  { %v2510_v54 = vpop.eup %2509 }
 0x3d1   :  { %v1001_v59 = vmul.f32 %v2510_v54, %v2508_v51 }
 0x3d3   :  { %v3331_v60 = vsel %vm2222_vm3, %v1001_v59, %v3275_v61 }
 0x3d4   :  { %v1094_v31 = vpack.c.bf16 %v3331_v60, %v3331_v60 }
 0x3d6   :  { %1128 = vmatmul.mubr.bf16.vlgmr.msra.gmra.mrb[12].mxu0 %v1094_v31  ;;  %1169 = vmatmul.mubr.bf16.vlgmr.msra.gmra.mrb[20].mxu1 %v1094_v31 }
 0x3d7   :  { %1216 = vmatpush1.bf16.msra.mxu0 %v3046_v3  ;;  %1257 = vmatpush1.bf16.msra.mxu1 %v3048_v4 }
 0x3d8   :  { %1247 = vmatprep.mubr.bf16.mxu0 %v2876_v0  ;;  %1288 = vmatprep.mubr.bf16.mxu1 %v2876_v0 }
 0x3d9   :  { %1298 = vmatprep.subr.bf16.mxu0 %v3051_v5  ;;  %1339 = vmatprep.subr.bf16.mxu1 %v3055_v6 }
 0x3de   :  { %2229 = vmatmul.mubr.msk.bf16.vlgmr.msra.gmra.mrb[16].mxu0 %vm240_vm0, %v1211_v55  ;;  %2230 = vmatmul.mubr.msk.bf16.vlgmr.msra.gmra.mrb[24].mxu1 %vm240_vm0, %v1211_v55 }
 0x3df   :  { %1299 = vmatpush1.bf16.msra.mxu0 %v3058_v8  ;;  %1340 = vmatpush1.bf16.msra.mxu1 %v3060_v9 }
 0x3e0   :  { %1300 = vmatprep.subr.bf16.mxu0 %v3063_v10  ;;  %1341 = vmatprep.subr.bf16.mxu1 %v3067_v11 }
 0x3e1   :  { %1330 = vmatprep.mubr.bf16.mxu0 %v2876_v0  ;;  %1371 = vmatprep.mubr.bf16.mxu1 %v2876_v0 }
 0x3e3   :  { %1301 = vmatpush1.bf16.msra.mxu0 %v3069_v12  ;;  %1342 = vmatpush1.bf16.msra.mxu1 %v3073_v13 }
 0x3e4   :  { %1302 = vmatprep.subr.bf16.mxu0 %v3077_v14  ;;  %1343 = vmatprep.subr.bf16.mxu1 %v3079_v15 }
 0x3e7   :  { %1303 = vmatpush1.bf16.msra.mxu0 %v3083_v16  ;;  %1344 = vmatpush1.bf16.msra.mxu1 %v3087_v17 }
 0x3e8   :  { %1304 = vmatprep.subr.bf16.mxu0 %v3091_v18  ;;  %1345 = vmatprep.subr.bf16.mxu1 %v3093_v19 }
 0x3eb   :  { %1305 = vmatpush1.bf16.msra.mxu0 %v3095_v20  ;;  %1346 = vmatpush1.bf16.msra.mxu1 %v3097_v21 }
 0x3ec   :  { %1306 = vmatprep.subr.bf16.mxu0 %v3101_v22  ;;  %1347 = vmatprep.subr.bf16.mxu1 %v3105_v23 }
 0x3ef   :  { %1307 = vmatpush1.bf16.msra.mxu0 %v3107_v24  ;;  %1348 = vmatpush1.bf16.msra.mxu1 %v3111_v25 }
 0x3f0   :  { %1308 = vmatprep.subr.bf16.mxu0 %v3115_v26  ;;  %1349 = vmatprep.subr.bf16.mxu1 %v3117_v27 }
 0x3f3   :  { %1309 = vmatpush1.bf16.msra.mxu0 %v3119_v28  ;;  %1350 = vmatpush1.bf16.msra.mxu1 %v3123_v29 }
 0x3f4   :  { %1310 = vmatprep.subr.bf16.mxu0 %v3125_v30  ;;  %1351 = vmatprep.subr.bf16.mxu1 %v3129_v32 }
 0x3f7   :  { %1311 = vmatpush1.bf16.msra.mxu0 %v3131_v33  ;;  %1352 = vmatpush1.bf16.msra.mxu1 %v3133_v34 }
 0x3f8   :  { %1312 = vmatprep.subr.bf16.mxu0 %v3135_v35  ;;  %1353 = vmatprep.subr.bf16.mxu1 %v3137_v36 }
 0x3fb   :  { %1313 = vmatpush1.bf16.msra.mxu0 %v3145_v37  ;;  %1354 = vmatpush1.bf16.msra.mxu1 %v3147_v38 }
 0x3fc   :  { %1418 = vmatprep.subr.bf16.mxu0 %v3041_v1  ;;  %1459 = vmatprep.subr.bf16.mxu1 %v3043_v2 }
 0x4a9   :  { %v1129_v61 = vpop.f32.mrb[12].mxu0  ;;  %v1170_v58 = vpop.f32.mrb[20].mxu1 }
 0x4aa   :  { %v2307_v39 = vadd.f32 %v1129_v61, %v3201_v47  ;;  %v1131_v62 = vpop.f32.mrb[13].mxu0  ;;  %v1172_v41 = vpop.f32.mrb[21].mxu1  ;;  %v2309_v1 = vadd.f32 %v1170_v58, %v3207_v63 }
 0x4ab   :  { %v2308_v40 = vadd.f32 %v1131_v62, %v3203_v48  ;;  %v1133_v42 = vpop.f32.mrb[14].mxu0  ;;  %v1174_v44 = vpop.f32.mrb[22].mxu1  ;;  %v2310_v2 = vadd.f32 %v1172_v41, %v3209_v7 }
 0x4ac   :  { %v2225_v46 = vmul.f32 -1.442695, %v2307_v39  ;;  %v1134_v43 = vpop.f32.mrb[15].mxu0  ;;  %v1175_v52 = vpop.f32.mrb[23].mxu1  ;;  %v2227_v50 = vmul.f32 -1.442695, %v2309_v1 }
 0x4ad   :  { %v2226_v56 = vmul.f32 -1.442695, %v2308_v40 }
 0x4ae   :  { %2511 = vpow2.f32 %v2225_v46 }
 0x4af   :  { %2513 = vpow2.f32 %v2226_v56 }
 0x4b0   :  { %2515 = vtanh.f32 %v2310_v2  ;;  %v3451_v2 = vld [vmem:[#allocation9] ss:$16 sps:$4 sm:$0xff]  }
 0x4b1   :  { %2517 = vpow2.f32 %v2227_v50  ;;  %v3454_v50 = vld [vmem:[#allocation9 + $0x8] ss:$16 sps:$4 sm:$0xff]  }
 0x4b8   :  { %v2512_v57 = vpop.eup %2511 }
 0x4b9   :  { %v1190_v49 = vadd.f32 1.0, %v2512_v57  ;;  %v2514_v51 = vpop.eup %2513  ;;  %v3459_v57 = vld [vmem:[#allocation12 + $0x4] ss:$16 sps:$4 sm:$0xff]  }
 0x4ba   :  { %v1191_v54 = vadd.f32 1.0, %v2514_v51  ;;  %v2516_v59 = vpop.eup %2515  ;;  %v1617_v51 = vld [vmem:[#allocation4 + $0x18] sm:$0xf] }
 0x4bb   :  { %2519 = vrcp.f32 %v1190_v49  ;;  %v2518_v31 = vpop.eup %2517  ;;  %v3462_v49 = vld [vmem:[#allocation12 + $0xc] ss:$16 sps:$4 sm:$0xff]  }
 0x4bc   :  { %2521 = vrcp.f32 %v1191_v54  ;;  %v1192_v62 = vadd.f32 1.0, %v2518_v31  ;;  %v3467_v54 = vld [vmem:[#allocation12] ss:$16 sps:$4 sm:$0xff]   ;;  %v3473_v31 = vld [vmem:[#allocation12 + $0x24] ss:$16 sps:$4 sm:$0xff]  }
 0x4be   :  { %2523 = vrcp.f32 %v1192_v62  ;;  %v3487_v62 = vld [vmem:[#allocation12 + $0x44] ss:$16 sps:$4 sm:$0xff]  }
 0x4c5   :  { %v2520_v55 = vpop.eup %2519 }
 0x4c6   :  { %v1201_v61 = vmul.f32 %v2520_v55, %v2516_v59  ;;  %v2522_v39 = vpop.eup %2521  ;;  %v3470_v59 = vld [vmem:[#allocation12 + $0x8] ss:$16 sps:$4 sm:$0xff]   ;;  %v3476_v55 = vld [vmem:[#allocation12 + $0x2c] ss:$16 sps:$4 sm:$0xff]  }
 0x4c7   :  { %v1200_v40 = vmul.f32 %v2522_v39, %v3328_v53  ;;  %v3484_v39 = vld [vmem:[#allocation12 + $0x28] ss:$16 sps:$4 sm:$0xff]  }
 0x4c8   :  { %v2524_v42 = vpop.eup %2523 }
 0x4c9   :  { %v1202_v58 = vadd.f32 %v1201_v61, %v1200_v40  ;;  %v3481_v61 = vld [vmem:[#allocation12 + $0x20] ss:$16 sps:$4 sm:$0xff]   ;;  %v3490_v40 = vld [vmem:[#allocation12 + $0x4c] ss:$16 sps:$4 sm:$0xff]  }
 0x4cb   :  { %2525 = vtanh.f32 %v1202_v58  ;;  %v3384_v41 = vsel %vm2228_vm4, %v1202_v58, %v3328_v53  ;;  %v1414_v53 = vld [vmem:[#allocation4 + $0x14] sm:$0xf]  ;;  %v3493_v58 = vld [vmem:[#allocation12 + $0x40] ss:$16 sps:$4 sm:$0xff]  }
 0x4d5   :  { %v2526_v44 = vpop.eup %2525 }
 0x4d6   :  { %v1204_v46 = vmul.f32 %v2526_v44, %v2524_v42  ;;  %v3499_v42 = vld [vmem:[#allocation12 + $0x64] ss:$16 sps:$4 sm:$0xff]   ;;  %v3502_v44 = vld [vmem:[#allocation12 + $0x6c] ss:$16 sps:$4 sm:$0xff]  }
 0x4d8   :  { %v3387_v43 = vsel %vm2228_vm4, %v1204_v46, %v3331_v60  ;;  %v3505_v46 = vld [vmem:[#allocation12 + $0x60] ss:$16 sps:$4 sm:$0xff]  }
 0x4d9   :  { %v1297_v52 = vpack.c.bf16 %v3387_v43, %v3387_v43 }
 0x4db   :  { %1331 = vmatmul.mubr.bf16.vlgmr.msra.gmra.mrb[16].mxu0 %v1297_v52  ;;  %1372 = vmatmul.mubr.bf16.vlgmr.msra.gmra.mrb[24].mxu1 %v1297_v52  ;;  %v3511_v52 = vld [vmem:[#allocation12 + $0x84] ss:$16 sps:$4 sm:$0xff]  }
 0x4dc   :  { %1419 = vmatpush1.bf16.msra.mxu0 %v3046_v3  ;;  %1460 = vmatpush1.bf16.msra.mxu1 %v3048_v4  ;;  %v3431_v3 = vld [vmem:[#allocation9 + $0x4] ss:$16 sps:$4 sm:$0xff]   ;;  %v3434_v4 = vld [vmem:[#allocation9 + $0xc] ss:$16 sps:$4 sm:$0xff]  }
 0x4dd   :  { %1450 = vmatprep.mubr.bf16.mxu0 %v2876_v0  ;;  %1491 = vmatprep.mubr.bf16.mxu1 %v2876_v0 }
 0x4de   :  { %1501 = vmatprep.subr.bf16.mxu0 %v3051_v5  ;;  %1542 = vmatprep.subr.bf16.mxu1 %v3055_v6 }
 0x4e3   :  { %2235 = vmatmul.mubr.msk.bf16.vlgmr.msra.gmra.mrb[20].mxu0 %vm240_vm0, %v1414_v53  ;;  %2236 = vmatmul.mubr.msk.bf16.vlgmr.msra.gmra.mrb[28].mxu1 %vm240_vm0, %v1414_v53  ;;  %v3514_v53 = vld [vmem:[#allocation12 + $0x8c] ss:$16 sps:$4 sm:$0xff]  }
 0x4e4   :  { %1502 = vmatpush1.bf16.msra.mxu0 %v3058_v8  ;;  %1543 = vmatpush1.bf16.msra.mxu1 %v3060_v9 }
 0x4e5   :  { %1503 = vmatprep.subr.bf16.mxu0 %v3063_v10  ;;  %1544 = vmatprep.subr.bf16.mxu1 %v3067_v11 }
 0x4e6   :  { %1533 = vmatprep.mubr.bf16.mxu0 %v2876_v0  ;;  %1574 = vmatprep.mubr.bf16.mxu1 %v2876_v0 }
 0x4e8   :  { %1504 = vmatpush1.bf16.msra.mxu0 %v3069_v12  ;;  %1545 = vmatpush1.bf16.msra.mxu1 %v3073_v13 }
 0x4e9   :  { %1505 = vmatprep.subr.bf16.mxu0 %v3077_v14  ;;  %1546 = vmatprep.subr.bf16.mxu1 %v3079_v15 }
 0x4ec   :  { %1506 = vmatpush1.bf16.msra.mxu0 %v3083_v16  ;;  %1547 = vmatpush1.bf16.msra.mxu1 %v3087_v17 }
 0x4ed   :  { %1507 = vmatprep.subr.bf16.mxu0 %v3091_v18  ;;  %1548 = vmatprep.subr.bf16.mxu1 %v3093_v19 }
 0x4f0   :  { %1508 = vmatpush1.bf16.msra.mxu0 %v3095_v20  ;;  %1549 = vmatpush1.bf16.msra.mxu1 %v3097_v21 }
 0x4f1   :  { %1509 = vmatprep.subr.bf16.mxu0 %v3101_v22  ;;  %1550 = vmatprep.subr.bf16.mxu1 %v3105_v23 }
 0x4f4   :  { %1510 = vmatpush1.bf16.msra.mxu0 %v3107_v24  ;;  %1551 = vmatpush1.bf16.msra.mxu1 %v3111_v25 }
 0x4f5   :  { %1511 = vmatprep.subr.bf16.mxu0 %v3115_v26  ;;  %1552 = vmatprep.subr.bf16.mxu1 %v3117_v27 }
 0x4f8   :  { %1512 = vmatpush1.bf16.msra.mxu0 %v3119_v28  ;;  %1553 = vmatpush1.bf16.msra.mxu1 %v3123_v29 }
 0x4f9   :  { %1513 = vmatprep.subr.bf16.mxu0 %v3125_v30  ;;  %1554 = vmatprep.subr.bf16.mxu1 %v3129_v32 }
 0x4fc   :  { %1514 = vmatpush1.bf16.msra.mxu0 %v3131_v33  ;;  %1555 = vmatpush1.bf16.msra.mxu1 %v3133_v34 }
 0x4fd   :  { %1515 = vmatprep.subr.bf16.mxu0 %v3135_v35  ;;  %1556 = vmatprep.subr.bf16.mxu1 %v3137_v36 }
 0x500   :  { %1516 = vmatpush1.bf16.msra.mxu0 %v3145_v37  ;;  %1557 = vmatpush1.bf16.msra.mxu1 %v3147_v38 }
 0x501   :  { %1621 = vmatprep.subr.bf16.mxu0 %v3431_v3  ;;  %1662 = vmatprep.subr.bf16.mxu1 %v3434_v4 }
 0x5ae   :  { %v1332_v5 = vpop.f32.mrb[16].mxu0  ;;  %v1373_v6 = vpop.f32.mrb[24].mxu1 }
 0x5af   :  { %v2311_v8 = vadd.f32 %v1332_v5, %v3201_v47  ;;  %v1334_v9 = vpop.f32.mrb[17].mxu0  ;;  %v1375_v10 = vpop.f32.mrb[25].mxu1  ;;  %v2313_v18 = vadd.f32 %v1373_v6, %v3207_v63  ;;  %v3517_v5 = vld [vmem:[#allocation12 + $0x80] ss:$16 sps:$4 sm:$0xff]   ;;  %v3520_v6 = vld [vmem:[#allocation12 + $0x88] ss:$16 sps:$4 sm:$0xff]  }
 0x5b0   :  { %v2312_v11 = vadd.f32 %v1334_v9, %v3203_v48  ;;  %v1336_v12 = vpop.f32.mrb[18].mxu0  ;;  %v1377_v13 = vpop.f32.mrb[26].mxu1  ;;  %v2314_v19 = vadd.f32 %v1375_v10, %v3209_v7  ;;  %v3526_v9 = vld [vmem:[#allocation12 + $0xac] ss:$16 sps:$4 sm:$0xff]   ;;  %v3529_v10 = vld [vmem:[#allocation12 + $0xa0] ss:$16 sps:$4 sm:$0xff]  }
 0x5b1   :  { %v2231_v14 = vmul.f32 -1.442695, %v2311_v8  ;;  %v1337_v15 = vpop.f32.mrb[19].mxu0  ;;  %v1378_v16 = vpop.f32.mrb[27].mxu1  ;;  %v2233_v20 = vmul.f32 -1.442695, %v2313_v18 }
 0x5b2   :  { %v2232_v17 = vmul.f32 -1.442695, %v2312_v11  ;;  %v3523_v8 = vld [vmem:[#allocation12 + $0xa4] ss:$16 sps:$4 sm:$0xff]   ;;  %v3532_v11 = vld [vmem:[#allocation12 + $0xa8] ss:$16 sps:$4 sm:$0xff]  }
 0x5b3   :  { %2527 = vpow2.f32 %v2231_v14  ;;  %v3535_v12 = vld [vmem:[#allocation12 + $0xc4] ss:$16 sps:$4 sm:$0xff]   ;;  %v3538_v13 = vld [vmem:[#allocation12 + $0xcc] ss:$16 sps:$4 sm:$0xff]   ;;  %v3541_v14 = vld [vmem:[#allocation12 + $0xc0] ss:$16 sps:$4 sm:$0xff]  }
 0x5b4   :  { %2529 = vpow2.f32 %v2232_v17  ;;  %v3544_v15 = vld [vmem:[#allocation12 + $0xc8] ss:$16 sps:$4 sm:$0xff]   ;;  %v3547_v16 = vld [vmem:[#allocation12 + $0xe4] ss:$16 sps:$4 sm:$0xff]   ;;  %v3550_v17 = vld [vmem:[#allocation12 + $0xec] ss:$16 sps:$4 sm:$0xff]  }
 0x5b5   :  { %2531 = vtanh.f32 %v2314_v19 }
 0x5b6   :  { %2533 = vpow2.f32 %v2233_v20 }
 0x5bd   :  { %v2528_v21 = vpop.eup %2527 }
 0x5be   :  { %v1393_v22 = vadd.f32 1.0, %v2528_v21  ;;  %v2530_v23 = vpop.eup %2529 }
 0x5bf   :  { %v1394_v24 = vadd.f32 1.0, %v2530_v23  ;;  %v2532_v25 = vpop.eup %2531 }
 0x5c0   :  { %2535 = vrcp.f32 %v1393_v22  ;;  %v2534_v26 = vpop.eup %2533 }
 0x5c1   :  { %2537 = vrcp.f32 %v1394_v24  ;;  %v1395_v30 = vadd.f32 1.0, %v2534_v26 }
 0x5c3   :  { %2539 = vrcp.f32 %v1395_v30 }
 0x5ca   :  { %v2536_v27 = vpop.eup %2535 }
 0x5cb   :  { %v1404_v28 = vmul.f32 %v2536_v27, %v2532_v25  ;;  %v2538_v29 = vpop.eup %2537 }
 0x5cc   :  { %v1403_v32 = vmul.f32 %v2538_v29, %v3384_v41 }
 0x5cd   :  { %v2540_v35 = vpop.eup %2539 }
 0x5ce   :  { %v1405_v33 = vadd.f32 %v1404_v28, %v1403_v32 }
 0x5d0   :  { %2541 = vtanh.f32 %v1405_v33  ;;  %v3444_v34 = vsel %vm2234_vm5, %v1405_v33, %v3384_v41  ;;  %v3496_v41 = vld [vmem:[#allocation12 + $0x48] ss:$16 sps:$4 sm:$0xff]  }
 0x5da   :  { %v2542_v36 = vpop.eup %2541 }
 0x5db   :  { %v1407_v60 = vmul.f32 %v2542_v36, %v2540_v35 }
 0x5dd   :  { %v3447_v56 = vsel %vm2234_vm5, %v1407_v60, %v3387_v43  ;;  %v3508_v43 = vld [vmem:[#allocation12 + $0x68] ss:$16 sps:$4 sm:$0xff]  }
 0x5de   :  { %v1500_v1 = vpack.c.bf16 %v3447_v56, %v3447_v56 }
 0x5e0   :  { %1534 = vmatmul.mubr.bf16.vlgmr.msra.gmra.mrb[20].mxu0 %v1500_v1  ;;  %1575 = vmatmul.mubr.bf16.vlgmr.msra.gmra.mrb[28].mxu1 %v1500_v1 }
 0x5e1   :  { %1622 = vmatpush1.bf16.msra.mxu0 %v3451_v2  ;;  %1663 = vmatpush1.bf16.msra.mxu1 %v3454_v50 }
 0x5e2   :  { %1653 = vmatprep.mubr.bf16.mxu0 %v2876_v0  ;;  %1694 = vmatprep.mubr.bf16.mxu1 %v2876_v0 }
 0x5e3   :  { %1704 = vmatprep.subr.bf16.mxu0 %v3459_v57  ;;  %1745 = vmatprep.subr.bf16.mxu1 %v3462_v49 }
 0x5e8   :  { %2241 = vmatmul.mubr.msk.bf16.vlgmr.msra.gmra.mrb[24].mxu0 %vm240_vm0, %v1617_v51  ;;  %2242 = vmatmul.mubr.msk.bf16.vlgmr.msra.gmra.mrb[32].mxu1 %vm240_vm0, %v1617_v51 }
 0x5e9   :  { %1705 = vmatpush1.bf16.msra.mxu0 %v3467_v54  ;;  %1746 = vmatpush1.bf16.msra.mxu1 %v3470_v59 }
 0x5ea   :  { %1706 = vmatprep.subr.bf16.mxu0 %v3473_v31  ;;  %1747 = vmatprep.subr.bf16.mxu1 %v3476_v55 }
 0x5eb   :  { %1736 = vmatprep.mubr.bf16.mxu0 %v2876_v0  ;;  %1777 = vmatprep.mubr.bf16.mxu1 %v2876_v0 }
 0x5ed   :  { %1707 = vmatpush1.bf16.msra.mxu0 %v3481_v61  ;;  %1748 = vmatpush1.bf16.msra.mxu1 %v3484_v39 }
 0x5ee   :  { %1708 = vmatprep.subr.bf16.mxu0 %v3487_v62  ;;  %1749 = vmatprep.subr.bf16.mxu1 %v3490_v40 }
 0x5f1   :  { %1709 = vmatpush1.bf16.msra.mxu0 %v3493_v58  ;;  %1750 = vmatpush1.bf16.msra.mxu1 %v3496_v41 }
 0x5f2   :  { %1710 = vmatprep.subr.bf16.mxu0 %v3499_v42  ;;  %1751 = vmatprep.subr.bf16.mxu1 %v3502_v44 }
 0x5f5   :  { %1711 = vmatpush1.bf16.msra.mxu0 %v3505_v46  ;;  %1752 = vmatpush1.bf16.msra.mxu1 %v3508_v43 }
 0x5f6   :  { %1712 = vmatprep.subr.bf16.mxu0 %v3511_v52  ;;  %1753 = vmatprep.subr.bf16.mxu1 %v3514_v53 }
 0x5f9   :  { %1713 = vmatpush1.bf16.msra.mxu0 %v3517_v5  ;;  %1754 = vmatpush1.bf16.msra.mxu1 %v3520_v6 }
 0x5fa   :  { %1714 = vmatprep.subr.bf16.mxu0 %v3523_v8  ;;  %1755 = vmatprep.subr.bf16.mxu1 %v3526_v9 }
 0x5fd   :  { %1715 = vmatpush1.bf16.msra.mxu0 %v3529_v10  ;;  %1756 = vmatpush1.bf16.msra.mxu1 %v3532_v11 }
 0x5fe   :  { %1716 = vmatprep.subr.bf16.mxu0 %v3535_v12  ;;  %1757 = vmatprep.subr.bf16.mxu1 %v3538_v13 }
 0x601   :  { %1717 = vmatpush1.bf16.msra.mxu0 %v3541_v14  ;;  %1758 = vmatpush1.bf16.msra.mxu1 %v3544_v15 }
 0x602   :  { %1718 = vmatprep.subr.bf16.mxu0 %v3547_v16  ;;  %1759 = vmatprep.subr.bf16.mxu1 %v3550_v17 }
 0x605   :  { %1719 = vmatpush1.bf16.msra.mxu0 %v3145_v37  ;;  %1760 = vmatpush1.bf16.msra.mxu1 %v3147_v38 }
 0x606   :  { %1824 = vmatprep.subr.bf16.mxu0 %v3431_v3  ;;  %1865 = vmatprep.subr.bf16.mxu1 %v3434_v4 }
 0x6b3   :  { %v1535_v18 = vpop.f32.mrb[20].mxu0  ;;  %v1576_v19 = vpop.f32.mrb[28].mxu1 }
 0x6b4   :  { %v2315_v20 = vadd.f32 %v1535_v18, %v3201_v47  ;;  %v1537_v21 = vpop.f32.mrb[21].mxu0  ;;  %v1578_v22 = vpop.f32.mrb[29].mxu1  ;;  %v2317_v38 = vadd.f32 %v1576_v19, %v3207_v63 }
 0x6b5   :  { %v2316_v23 = vadd.f32 %v1537_v21, %v3203_v48  ;;  %v1539_v24 = vpop.f32.mrb[22].mxu0  ;;  %v1580_v25 = vpop.f32.mrb[30].mxu1  ;;  %v2318_v3 = vadd.f32 %v1578_v22, %v3209_v7 }
 0x6b6   :  { %v2237_v26 = vmul.f32 -1.442695, %v2315_v20  ;;  %v1540_v27 = vpop.f32.mrb[23].mxu0  ;;  %v1581_v28 = vpop.f32.mrb[31].mxu1  ;;  %v2239_v4 = vmul.f32 -1.442695, %v2317_v38 }
 0x6b7   :  { %v2238_v37 = vmul.f32 -1.442695, %v2316_v23  ;;  %v2455_v28 = vld [vmem:[#allocation16] sm:$0xff]   ;;  %v2456_v38 = vld [vmem:[#allocation16 + $0x8] sm:$0xff]  }
 0x6b8   :  { %2543 = vpow2.f32 %v2237_v26 }
 0x6b9   :  { %2545 = vpow2.f32 %v2238_v37  ;;  %v2877_v37 = vmov 0.0  }
 0x6ba   :  { %2547 = vtanh.f32 %v2318_v3  ;;  %v2457_v3 = vld [vmem:[#allocation16 + $0x10] sm:$0xff]  }
 0x6bb   :  { %2549 = vpow2.f32 %v2239_v4  ;;  %v2458_v4 = vld [vmem:[#allocation16 + $0x18] sm:$0xff]  }
 0x6c2   :  { %v2544_v29 = vpop.eup %2543 }
 0x6c3   :  { %v1596_v30 = vadd.f32 1.0, %v2544_v29  ;;  %v2546_v32 = vpop.eup %2545  ;;  %v2459_v29 = vld [vmem:[#allocation16 + $0x20] sm:$0xff]  }
 0x6c4   :  { %v1597_v33 = vadd.f32 1.0, %v2546_v32  ;;  %v2548_v35 = vpop.eup %2547  ;;  %v2461_v32 = vld [vmem:[#allocation16 + $0x30] sm:$0xff]  }
 0x6c5   :  { %2551 = vrcp.f32 %v1596_v30  ;;  %v2550_v36 = vpop.eup %2549  ;;  %v2460_v30 = vld [vmem:[#allocation16 + $0x28] sm:$0xff]  }
 0x6c6   :  { %2553 = vrcp.f32 %v1597_v33  ;;  %v1598_v18 = vadd.f32 1.0, %v2550_v36  ;;  %v2462_v33 = vld [vmem:[#allocation16 + $0x38] sm:$0xff]  }
 0x6c8   :  { %2555 = vrcp.f32 %v1598_v18 }
 0x6cf   :  { %v2552_v60 = vpop.eup %2551 }
 0x6d0   :  { %v1607_v1 = vmul.f32 %v2552_v60, %v2548_v35  ;;  %v2554_v51 = vpop.eup %2553 }
 0x6d1   :  { %v1606_v20 = vmul.f32 %v2554_v51, %v3444_v34 }
 0x6d2   :  { %v2556_v22 = vpop.eup %2555 }
 0x6d3   :  { %v1608_v19 = vadd.f32 %v1607_v1, %v1606_v20 }
 0x6d5   :  { %2557 = vtanh.f32 %v1608_v19  ;;  %v3564_v21 = vsel %vm2240_vm6, %v1608_v19, %v3444_v34  ;;  %v1820_v34 = vld [vmem:[#allocation4 + $0x1c] sm:$0xf] }
 0x6df   :  { %v2558_v23 = vpop.eup %2557 }
 0x6e0   :  { %v1610_v24 = vmul.f32 %v2558_v23, %v2556_v22 }
 0x6e2   :  { %v3567_v25 = vsel %vm2240_vm6, %v1610_v24, %v3447_v56  ;;  %v2630_v56 = vld [vmem:[#allocation12 + $0xe8] ss:$16 sps:$4 sm:$0xff]  }
 0x6e3   :  { %v1703_v26 = vpack.c.bf16 %v3567_v25, %v3567_v25 }
 0x6e5   :  { %1737 = vmatmul.mubr.bf16.vlgmr.msra.gmra.mrb[24].mxu0 %v1703_v26  ;;  %1778 = vmatmul.mubr.bf16.vlgmr.msra.gmra.mrb[32].mxu1 %v1703_v26 }
 0x6e6   :  { %1825 = vmatpush1.bf16.msra.mxu0 %v3451_v2  ;;  %1866 = vmatpush1.bf16.msra.mxu1 %v3454_v50 }
 0x6e7   :  { %1856 = vmatprep.mubr.bf16.mxu0 %v2876_v0  ;;  %1897 = vmatprep.mubr.bf16.mxu1 %v2876_v0 }
 0x6e8   :  { %1907 = vmatprep.subr.bf16.mxu0 %v3459_v57  ;;  %1948 = vmatprep.subr.bf16.mxu1 %v3462_v49 }
 0x6ed   :  { %2247 = vmatmul.mubr.msk.bf16.vlgmr.msra.gmra.mrb[28].mxu0 %vm240_vm0, %v1820_v34  ;;  %2248 = vmatmul.mubr.msk.bf16.vlgmr.msra.gmra.mrb[36].mxu1 %vm240_vm0, %v1820_v34 }
 0x6ee   :  { %1908 = vmatpush1.bf16.msra.mxu0 %v3467_v54  ;;  %1949 = vmatpush1.bf16.msra.mxu1 %v3470_v59 }
 0x6ef   :  { %1909 = vmatprep.subr.bf16.mxu0 %v3473_v31  ;;  %1950 = vmatprep.subr.bf16.mxu1 %v3476_v55 }
 0x6f0   :  { %1939 = vmatprep.mubr.bf16.mxu0 %v2876_v0  ;;  %1980 = vmatprep.mubr.bf16.mxu1 %v2876_v0  ;;  %v2629_v0 = vld [vmem:[#allocation12 + $0xe0] ss:$16 sps:$4 sm:$0xff]  }
 0x6f2   :  { %1910 = vmatpush1.bf16.msra.mxu0 %v3481_v61  ;;  %1951 = vmatpush1.bf16.msra.mxu1 %v3484_v39 }
 0x6f3   :  { %1911 = vmatprep.subr.bf16.mxu0 %v3487_v62  ;;  %1952 = vmatprep.subr.bf16.mxu1 %v3490_v40 }
 0x6f6   :  { %1912 = vmatpush1.bf16.msra.mxu0 %v3493_v58  ;;  %1953 = vmatpush1.bf16.msra.mxu1 %v3496_v41 }
 0x6f7   :  { %1913 = vmatprep.subr.bf16.mxu0 %v3499_v42  ;;  %1954 = vmatprep.subr.bf16.mxu1 %v3502_v44 }
 0x6fa   :  { %1914 = vmatpush1.bf16.msra.mxu0 %v3505_v46  ;;  %1955 = vmatpush1.bf16.msra.mxu1 %v3508_v43 }
 0x6fb   :  { %1915 = vmatprep.subr.bf16.mxu0 %v3511_v52  ;;  %1956 = vmatprep.subr.bf16.mxu1 %v3514_v53 }
 0x6fe   :  { %1916 = vmatpush1.bf16.msra.mxu0 %v3517_v5  ;;  %1957 = vmatpush1.bf16.msra.mxu1 %v3520_v6 }
 0x6ff   :  { %1917 = vmatprep.subr.bf16.mxu0 %v3523_v8  ;;  %1958 = vmatprep.subr.bf16.mxu1 %v3526_v9 }
 0x702   :  { %1918 = vmatpush1.bf16.msra.mxu0 %v3529_v10  ;;  %1959 = vmatpush1.bf16.msra.mxu1 %v3532_v11 }
 0x703   :  { %1919 = vmatprep.subr.bf16.mxu0 %v3535_v12  ;;  %1960 = vmatprep.subr.bf16.mxu1 %v3538_v13 }
 0x706   :  { %1920 = vmatpush1.bf16.msra.mxu0 %v3541_v14  ;;  %1961 = vmatpush1.bf16.msra.mxu1 %v3544_v15 }
 0x707   :  { %1921 = vmatprep.subr.bf16.mxu0 %v3547_v16  ;;  %1962 = vmatprep.subr.bf16.mxu1 %v3550_v17 }
 0x70a   :  { %1922 = vmatpush1.bf16.msra.mxu0 %v2629_v0  ;;  %1963 = vmatpush1.bf16.msra.mxu1 %v2630_v56 }
 0x70b   :  { %2271 = vmatprep.subr.bf16.mxu0 %v2877_v37 }
 0x7b8   :  { %v1738_v2 = vpop.f32.mrb[24].mxu0  ;;  %v1779_v50 = vpop.f32.mrb[32].mxu1 }
 0x7b9   :  { %v2319_v57 = vadd.f32 %v1738_v2, %v3201_v47  ;;  %v1740_v49 = vpop.f32.mrb[25].mxu0  ;;  %v1781_v54 = vpop.f32.mrb[33].mxu1  ;;  %v2321_v58 = vadd.f32 %v1779_v50, %v3207_v63 }
 0x7ba   :  { %v2320_v59 = vadd.f32 %v1740_v49, %v3203_v48  ;;  %v1742_v31 = vpop.f32.mrb[26].mxu0  ;;  %v1783_v55 = vpop.f32.mrb[34].mxu1  ;;  %v2322_v41 = vadd.f32 %v1781_v54, %v3209_v7 }
 0x7bb   :  { %v2243_v61 = vmul.f32 -1.442695, %v2319_v57  ;;  %v1743_v39 = vpop.f32.mrb[27].mxu0  ;;  %v1784_v62 = vpop.f32.mrb[35].mxu1  ;;  %v2245_v42 = vmul.f32 -1.442695, %v2321_v58 }
 0x7bc   :  { %v2244_v40 = vmul.f32 -1.442695, %v2320_v59 }
 0x7bd   :  { %2559 = vpow2.f32 %v2243_v61 }
 0x7be   :  { %2561 = vpow2.f32 %v2244_v40  ;;  %v2253_v40 = vld [vmem:[#allocation18] ss:$0 sm:$0xff] }
 0x7bf   :  { %2563 = vtanh.f32 %v2322_v41 }
 0x7c0   :  { %2565 = vpow2.f32 %v2245_v42 }
 0x7c7   :  { %v2560_v44 = vpop.eup %2559 }
 0x7c8   :  { %v1799_v46 = vadd.f32 1.0, %v2560_v44  ;;  %v2562_v43 = vpop.eup %2561 }
 0x7c9   :  { %v1800_v52 = vadd.f32 1.0, %v2562_v43  ;;  %v2564_v53 = vpop.eup %2563 }
 0x7ca   :  { %2567 = vrcp.f32 %v1799_v46  ;;  %v2566_v5 = vpop.eup %2565 }
 0x7cb   :  { %2569 = vrcp.f32 %v1800_v52  ;;  %v1801_v10 = vadd.f32 1.0, %v2566_v5 }
 0x7cd   :  { %2571 = vrcp.f32 %v1801_v10 }
 0x7d4   :  { %v2568_v6 = vpop.eup %2567 }
 0x7d5   :  { %v1810_v8 = vmul.f32 %v2568_v6, %v2564_v53  ;;  %v2570_v9 = vpop.eup %2569 }
 0x7d6   :  { %v1809_v11 = vmul.f32 %v2570_v9, %v3564_v21 }
 0x7d7   :  { %v2572_v14 = vpop.eup %2571 }
 0x7d8   :  { %v1811_v12 = vadd.f32 %v1810_v8, %v1809_v11 }
 0x7da   :  { %2573 = vtanh.f32 %v1811_v12  ;;  %v3616_v13 = vsel %vm2246_vm7, %v1811_v12, %v3564_v21 }
 0x7e4   :  { %v2574_v15 = vpop.eup %2573 }
 0x7e5   :  { %v1813_v16 = vmul.f32 %v2574_v15, %v2572_v14 }
 0x7e7   :  { %v3619_v17 = vsel %vm2246_vm7, %v1813_v16, %v3567_v25 }
 0x7e8   :  { %v1906_v27 = vpack.c.bf16 %v3619_v17, %v3619_v17 }
 0x7ea   :  { %1940 = vmatmul.mubr.bf16.vlgmr.msra.gmra.mrb[28].mxu0 %v1906_v27  ;;  %1981 = vmatmul.mubr.bf16.vlgmr.msra.gmra.mrb[36].mxu1 %v1906_v27 }
 0x7eb   :  { %2272 = vmatpush3.bf16.msra.mxu0 %v2455_v28  ;;  %2287 = vmatprep.mubr.msk.bf16.mxu0 %vm2878_vm8, %v2877_v37 }
 0x7ec   :  { %2273 = vmatprep.subr.bf16.mxu0 %v2877_v37 }
 0x7ef   :  { %2274 = vmatpush3.bf16.msra.mxu0 %v2456_v38 }
 0x7f0   :  { %2275 = vmatprep.subr.bf16.mxu0 %v2877_v37 }
 0x7f3   :  { %2276 = vmatpush3.bf16.msra.mxu0 %v2457_v3 }
 0x7f4   :  { %2277 = vmatprep.subr.bf16.mxu0 %v2877_v37 }
 0x7f7   :  { %2278 = vmatpush3.bf16.msra.mxu0 %v2458_v4 }
 0x7f8   :  { %2279 = vmatprep.subr.bf16.mxu0 %v2877_v37 }
 0x7fb   :  { %2280 = vmatpush3.bf16.msra.mxu0 %v2459_v29 }
 0x7fc   :  { %2281 = vmatprep.subr.bf16.mxu0 %v2877_v37 }
 0x7ff   :  { %2282 = vmatpush3.bf16.msra.mxu0 %v2460_v30 }
 0x800   :  { %2283 = vmatprep.subr.bf16.mxu0 %v2877_v37 }
 0x803   :  { %2284 = vmatpush3.bf16.msra.mxu0 %v2461_v32 }
 0x804   :  { %2285 = vmatprep.subr.bf16.mxu0 %v2877_v37 }
 0x807   :  { %2286 = vmatpush3.bf16.msra.mxu0 %v2462_v33 }
 0x8bd   :  { %v1941_v35 = vpop.f32.mrb[28].mxu0  ;;  %v1982_v36 = vpop.f32.mrb[36].mxu1 }
 0x8be   :  { %v2323_v60 = vadd.f32 %v1941_v35, %v3201_v47  ;;  %v1943_v1 = vpop.f32.mrb[29].mxu0  ;;  %v1984_v51 = vpop.f32.mrb[37].mxu1  ;;  %v2325_v25 = vadd.f32 %v1982_v36, %v3207_v63 }
 0x8bf   :  { %v2324_v18 = vadd.f32 %v1943_v1, %v3203_v48  ;;  %v1945_v20 = vpop.f32.mrb[30].mxu0  ;;  %v1986_v19 = vpop.f32.mrb[38].mxu1  ;;  %v2326_v26 = vadd.f32 %v1984_v51, %v3209_v7 }
 0x8c0   :  { %v2249_v21 = vmul.f32 -1.442695, %v2323_v60  ;;  %v1946_v22 = vpop.f32.mrb[31].mxu0  ;;  %v1987_v23 = vpop.f32.mrb[39].mxu1  ;;  %v2251_v34 = vmul.f32 -1.442695, %v2325_v25 }
 0x8c1   :  { %v2250_v24 = vmul.f32 -1.442695, %v2324_v18 }
 0x8c2   :  { %2575 = vpow2.f32 %v2249_v21 }
 0x8c3   :  { %2577 = vpow2.f32 %v2250_v24 }
 0x8c4   :  { %2579 = vtanh.f32 %v2326_v26 }
 0x8c5   :  { %2581 = vpow2.f32 %v2251_v34 }
 0x8cc   :  { %v2576_v0 = vpop.eup %2575 }
 0x8cd   :  { %v2002_v56 = vadd.f32 1.0, %v2576_v0  ;;  %v2578_v47 = vpop.eup %2577 }
 0x8ce   :  { %v2003_v48 = vadd.f32 1.0, %v2578_v47  ;;  %v2580_v2 = vpop.eup %2579 }
 0x8cf   :  { %2583 = vrcp.f32 %v2002_v56  ;;  %v2582_v50 = vpop.eup %2581 }
 0x8d0   :  { %2585 = vrcp.f32 %v2003_v48  ;;  %v2004_v59 = vadd.f32 1.0, %v2582_v50 }
 0x8d2   :  { %2587 = vrcp.f32 %v2004_v59 }
 0x8d9   :  { %v2584_v57 = vpop.eup %2583 }
 0x8da   :  { %v2013_v49 = vmul.f32 %v2584_v57, %v2580_v2  ;;  %v2586_v54 = vpop.eup %2585 }
 0x8db   :  { %v2012_v31 = vmul.f32 %v2586_v54, %v3616_v13 }
 0x8dc   :  { %v2588_v7 = vpop.eup %2587 }
 0x8dd   :  { %v2014_v63 = vadd.f32 %v2013_v49, %v2012_v31 }
 0x8df   :  { %2589 = vtanh.f32 %v2014_v63 }
 0x8e9   :  { %v2590_v55 = vpop.eup %2589 }
 0x8ea   :  { %v2016_v61 = vmul.f32 %v2590_v55, %v2588_v7 }
 0x8ec   :  { %v2020_v39 = vsel %vm2252_vm9, %v2016_v61, %v3619_v17 }
 0x8ed   :  { %v2027_v62 = vpack.c.bf16 %v2020_v39, %v2020_v39 }
 0x8ef   :  { %2288 = vmatmul.mubr.bf16.vlgmr.msra.gmra.mrb[32].mxu0 %v2027_v62 }
 0x9c2   :  { %v2133_v58 = vpop.f32.mrb[32].mxu0 }
 0x9c3   :  { %v2134_v41 = vadd.f32 %v2253_v40, %v2133_v58  ;;  %v2289_v42 = vpop.f32.mrb[33].mxu0 }
 0x9c4   :  { %v2136_v44 = vpop.f32.mrb[34].mxu0 }
 0x9c5   :  { %2139 = vmax.xlane.f32.xlu0 %v2134_v41  ;;  %v2290_v46 = vpop.f32.mrb[35].mxu0 }
 0xa52   :  { %v2140_v43 = vpop.xlane.xlu0 %2139 }
 0xa53   :  { %v2141_v52 = vsub.f32 %v2134_v41, %v2140_v43 }
 0xa55   :  { %v2142_v53 = vmul.f32 1.442695, %v2141_v52 }
 0xa57   :  { %2591 = vpow2.f32 %v2142_v53 }
 0xa61   :  { %v2592_v5 = vpop.eup %2591 }
 0xa62   :  { %2144 = vadd.xlane.f32.xlu1 %v2592_v5 }
 0xaef   :  { %v2145_v6 = vpop.xlane.xlu1 %2144 }
 0xaf0   :  { %2593 = vlog2.f32 %v2145_v6 }
 0xafa   :  { %v2594_v45 = vpop.eup %2593 }
 0xafb   :  { %v2147_v8 = vmul.f32 0.6931472, %v2594_v45 }
 0xafd   :  { %v2148_v9 = vsub.f32 %v2141_v52, %v2147_v8 }
 0xaff   :  { %2149 = vst [vmem:[#allocation19] sm:$0xff] %v2148_v9 }
 0xb00   :  { %2840 = shalt.err (!%p2837_p6)
}
 0xb01   :  { %s2841_s22 = scalar_lea.hbm %s3651_s9, 128 }
 0xb02   :  { %p2842_p7 = scmp.ne.s32.totalorder %s3651_s9, %s2841_s22  ;;  %p2845_p8 = scmp.lt.u32.totalorder %s2841_s22, %s3651_s9 }
 0xb04   :  { %p2847_p9 = pnand %p2845_p8, %p2842_p7 }
 0xb06   :  { %2850 = shalt.err (!%p2847_p9)
}
 0xb07   :  { %2159 = dma.vmem_to_hbm [thread:$0]  %s2157_s3, 128, %s3651_s9, [#allocation6]  }
 0xb08   :  { %2861 = dma.done.wait [#allocation6], 128  }
 0xb09   :  { %2862 = vsyncadd [#allocation6], 4294967168 }
 0xb0a   :  { %2163 = vsyncpa [#allocation5], 1 }
 0xb0b   :  { %2164 = vsyncpa [#allocation8], 1 }
 0xb0c   :  { %2165 = vsyncpa [#allocation11], 1 }
 0xb0d   :  { %2166 = vsyncpa [#allocation14], 1 }
 0xb0e   :  { %2167 = vsyncpa [#allocation17], 1 }
 0xb0f   :  { %2168 = vsyncpa [#allocation6], 1 }

</bundles_post_ra>
